<compile_context>
chip_gen: v6e
topology: v6e:2x2x1
jax: 0.10.0
libtpu: 0.0.40
codegen_flags: <defaults>
</compile_context>

<pallas_src>
import functools

import jax
import jax.numpy as jnp
import numpy as np
from jax.experimental import pallas as pl
from jax.experimental.pallas import tpu as pltpu


# ---------------------------------------------------------------------------
# Pallas kernels
# ---------------------------------------------------------------------------

def _fused_attn_ln_kernel(*refs, num_heads, has_qpe, has_kpe, add_residual,
                          eps):
    """LayerNorm(residual + out_proj(MHA(q_base+q_pe, k_base+k_pe, v)))."""
    it = iter(refs)
    q_ref = next(it)
    qpe_ref = next(it) if has_qpe else None
    k_ref = next(it)
    kpe_ref = next(it) if has_kpe else None
    v_ref = next(it)
    wq_ref, bq_ref, wk_ref, bk_ref, wv_ref, bv_ref, wo_ref, bo_ref = (
        next(it) for _ in range(8))
    g_ref, b_ref = next(it), next(it)
    o_ref = next(it)
    qp_sc, m_sc, l_sc, acc_sc = next(it), next(it), next(it), next(it)

    ki = pl.program_id(2)
    nk = pl.num_programs(2)
    tq = q_ref.shape[1]
    d_in = wq_ref.shape[1]          # internal dim Di
    hd = d_in // num_heads
    mm_dt = q_ref.dtype             # MXU operand dtype (bf16 stays bf16)

    # ---- init once per (batch, q-tile): pre-scaled q projection + accums
    @pl.when(ki == 0)
    def _init():
        q = q_ref[0]
        if has_qpe:
            q = q + qpe_ref[0]
        # softmax scale already folded into wq/bq on the host
        qp = jnp.dot(q, wq_ref[...],
                     preferred_element_type=jnp.float32) + bq_ref[...]
        qp_sc[...] = qp.astype(mm_dt)
        m_sc[...] = jnp.full(m_sc.shape, -jnp.inf, jnp.float32)
        l_sc[...] = jnp.zeros(l_sc.shape, jnp.float32)
        acc_sc[...] = jnp.zeros(acc_sc.shape, jnp.float32)

    # ---- this kv tile: full-width, lane-dense k/v projections (TK, Di)
    k = k_ref[0]
    if has_kpe:
        k = k + kpe_ref[0]
    kp = (jnp.dot(k, wk_ref[...], preferred_element_type=jnp.float32)
          + bk_ref[...]).astype(mm_dt)
    vp = (jnp.dot(v_ref[0], wv_ref[...], preferred_element_type=jnp.float32)
          + bv_ref[...]).astype(mm_dt)

    qp = qp_sc[...]                                   # (tq, Di) in mm_dt

    # ---- online softmax, static per-head lane slices (no head relayouts)
    for h in range(num_heads):
        hs, he = h * hd, (h + 1) * hd
        # logits: contraction on the last dims (no materialized k transpose)
        s = jax.lax.dot_general(
            qp[:, hs:he], kp[:, hs:he],
            (((1,), (1,)), ((), ())),
            preferred_element_type=jnp.float32)       # (tq, tk)
        m_prev = m_sc[:, h:h + 1]                     # (tq, 1)
        m_new = jnp.maximum(m_prev, s.max(axis=-1, keepdims=True))
        alpha = jnp.exp(m_prev - m_new)
        p = jnp.exp(s - m_new)                        # (tq, tk) lane-dense
        l_sc[:, h:h + 1] = alpha * l_sc[:, h:h + 1] + p.sum(axis=-1,
                                                            keepdims=True)
        acc_sc[:, hs:he] = alpha * acc_sc[:, hs:he] + jnp.dot(
            p.astype(mm_dt), vp[:, hs:he], preferred_element_type=jnp.float32)
        m_sc[:, h:h + 1] = m_new

    # ---- finalize: normalize, single out-proj, residual add, LayerNorm
    @pl.when(ki == nk - 1)
    def _finalize():
        inv_l = pl.reciprocal(l_sc[...], approx=True)        # EUP, (tq, H)
        acc = acc_sc[...].reshape(tq, num_heads, hd)
        merged = (acc * inv_l.reshape(tq, num_heads, 1)).reshape(tq, d_in)
        out = jnp.dot(merged.astype(mm_dt), wo_ref[...],
                      preferred_element_type=jnp.float32) + bo_ref[...]
        x = out
        if add_residual:
            x = x + q_ref[0].astype(jnp.float32)
        mu = jnp.mean(x, axis=-1, keepdims=True)
        xc = x - mu
        var = jnp.mean(xc * xc, axis=-1, keepdims=True)
        y = xc * jax.lax.rsqrt(var + eps)
        o_ref[0] = (y * g_ref[...] + b_ref[...]).astype(o_ref.dtype)


def _fused_mlp_ln_kernel(x_ref, w1_ref, b1_ref, w2_ref, b2_ref, g_ref, b_ref,
                         o_ref, *, eps):
    """LayerNorm(x + Linear(ReLU(Linear(x))))."""
    x = x_ref[0]
    h = jnp.dot(x, w1_ref[...], preferred_element_type=jnp.float32) + b1_ref[...]
    h = jnp.maximum(h, 0.0)
    m = jnp.dot(h.astype(x_ref.dtype), w2_ref[...],
                preferred_element_type=jnp.float32) + b2_ref[...]
    z = x.astype(jnp.float32) + m
    mu = jnp.mean(z, axis=-1, keepdims=True)
    zc = z - mu
    var = jnp.mean(zc * zc, axis=-1, keepdims=True)
    y = zc * jax.lax.rsqrt(var + eps)
    o_ref[0] = (y * g_ref[...] + b_ref[...]).astype(o_ref.dtype)


# ---------------------------------------------------------------------------
# Pallas wrappers
# ---------------------------------------------------------------------------

_VMEM_LIMIT = 48 * 1024 * 1024   # above default scoped limit on every gen,
                                 # below v7x's 64 MiB physical


def _pick_tile(n, target):
    """Largest tile <= target that evenly divides n, 8-aligned (or full n)."""
    # TODO(synk): add a padded+masked path for axis lengths with no 8-aligned
    # divisor instead of silently falling back to the full axis.
    if n <= target:
        return n
    t = target - target % 8
    while t >= 8:
        if n % t == 0:
            return t
        t -= 8
    return n


def _tile_targets():
    """Per-generation (TQ, TK) targets. TQ=256 fills the v6e/v7x MXU M dim."""
    vmem_bytes = 128 * 1024 * 1024
    try:
        vmem_bytes = getattr(pltpu.get_tpu_info(), "vmem_capacity_bytes",
                             vmem_bytes)
    except Exception:
        pass
    if vmem_bytes <= 64 * 1024 * 1024:
        # v7x-class: tighter VMEM, very high HBM BW -> spend VMEM on TQ,
        # keep kv streaming tiles modest.
        return 256, 512
    # v5e/v6e: ample VMEM, lower HBM BW -> long kv tiles amortize the
    # per-grid-step overhead and hide the kv DMA.
    return 256, 1024


def pallas_attention_ln(p, ln, q_base, q_pe, k_base, k_pe, v, num_heads,
                        add_residual, eps=1e-5):
    B, Nq, D = q_base.shape
    Nk = k_base.shape[1]
    Di = p["wq"].shape[1]
    hd = Di // num_heads
    scale = float(hd) ** -0.5
    has_qpe = q_pe is not None
    has_kpe = k_pe is not None
    act_dt = q_base.dtype

    tq_target, tk_target = _tile_targets()
    TQ = _pick_tile(Nq, tq_target)      # query-tile axis (parallel, megacore)
    TK = _pick_tile(Nk, tk_target)      # kv tile axis (arbitrary, online softmax)
    grid = (B, Nq // TQ, Nk // TK)
    # TODO(synk): for v7x (2 TCs) at batch=1 the token-side attentions have no
    # parallel grid work; split heads into core groups with a revisit-combine.

    # Host-side prep: fold softmax scale into the q projection; cast weight
    # matrices to the activation dtype so every dot has matched MXU operands.
    wq = (p["wq"] * scale).astype(act_dt)
    bq = (p["bq"] * scale).astype(jnp.float32)
    wk = p["wk"].astype(act_dt)
    wv = p["wv"].astype(act_dt)
    wo = p["wo"].astype(act_dt)
    bk = p["bk"].astype(jnp.float32)
    bv = p["bv"].astype(jnp.float32)
    bo = p["bo"].astype(jnp.float32)
    gamma = ln["gamma"].astype(jnp.float32)
    beta = ln["beta"].astype(jnp.float32)

    q_map = lambda b, qi, ki: (b, qi, 0)
    k_map = lambda b, qi, ki: (b, ki, 0)
    w_map = lambda b, qi, ki: (0, 0)

    arrays, in_specs = [], []

    def add(arr, spec):
        arrays.append(arr)
        in_specs.append(spec)

    add(q_base, pl.BlockSpec((1, TQ, D), q_map))
    if has_qpe:
        add(q_pe, pl.BlockSpec((1, TQ, D), q_map))
    add(k_base, pl.BlockSpec((1, TK, D), k_map))
    if has_kpe:
        add(k_pe, pl.BlockSpec((1, TK, D), k_map))
    add(v, pl.BlockSpec((1, TK, D), k_map))
    for arr in (wq, bq, wk, bk, wv, bv, wo, bo, gamma, beta):
        add(arr, pl.BlockSpec(arr.shape, w_map))

    kernel = functools.partial(
        _fused_attn_ln_kernel, num_heads=num_heads,
        has_qpe=has_qpe, has_kpe=has_kpe, add_residual=add_residual, eps=eps)

    return pl.pallas_call(
        kernel,
        out_shape=jax.ShapeDtypeStruct((B, Nq, D), act_dt),
        grid=grid,
        in_specs=in_specs,
        out_specs=pl.BlockSpec((1, TQ, D), q_map),
        scratch_shapes=[
            pltpu.VMEM((TQ, Di), act_dt),               # pre-scaled q proj (MXU dtype)
            pltpu.VMEM((TQ, num_heads), jnp.float32),   # running max per head
            pltpu.VMEM((TQ, num_heads), jnp.float32),   # running denom per head
            pltpu.VMEM((TQ, Di), jnp.float32),          # lane-dense output accumulator
        ],
        compiler_params=pltpu.CompilerParams(
            dimension_semantics=("parallel", "parallel", "arbitrary"),
            vmem_limit_bytes=_VMEM_LIMIT),
    )(*arrays)


def pallas_mlp_ln(p, ln, x, eps=1e-5):
    B, N, D = x.shape
    act_dt = x.dtype
    TQ = _pick_tile(N, 256)
    grid = (B, N // TQ)
    x_map = lambda b, i: (b, i, 0)
    w_map = lambda b, i: (0, 0)

    w1 = p["w1"].astype(act_dt)
    w2 = p["w2"].astype(act_dt)
    b1 = p["b1"].astype(jnp.float32)
    b2 = p["b2"].astype(jnp.float32)
    gamma = ln["gamma"].astype(jnp.float32)
    beta = ln["beta"].astype(jnp.float32)

    arrays = [x, w1, b1, w2, b2, gamma, beta]
    in_specs = [pl.BlockSpec((1, TQ, D), x_map)]
    for arr in arrays[1:]:
        in_specs.append(pl.BlockSpec(arr.shape, w_map))

    return pl.pallas_call(
        functools.partial(_fused_mlp_ln_kernel, eps=eps),
        out_shape=jax.ShapeDtypeStruct((B, N, D), act_dt),
        grid=grid,
        in_specs=in_specs,
        out_specs=pl.BlockSpec((1, TQ, D), x_map),
        compiler_params=pltpu.CompilerParams(
            dimension_semantics=("parallel", "parallel"),
            vmem_limit_bytes=_VMEM_LIMIT),
    )(*arrays)


# ---------------------------------------------------------------------------
# Pure-JAX references (for correctness check)
# ---------------------------------------------------------------------------

def ref_attention_ln(p, ln, q_base, q_pe, k_base, k_pe, v, num_heads,
                     add_residual, eps=1e-5):
    q = q_base if q_pe is None else q_base + q_pe
    k = k_base if k_pe is None else k_base + k_pe
    qp = q @ p["wq"] + p["bq"][0]
    kp = k @ p["wk"] + p["bk"][0]
    vp = v @ p["wv"] + p["bv"][0]
    B, Nq, Di = qp.shape
    Nk = kp.shape[1]
    hd = Di // num_heads
    scale = float(hd) ** -0.5
    qh = qp.reshape(B, Nq, num_heads, hd)
    kh = kp.reshape(B, Nk, num_heads, hd)
    vh = vp.reshape(B, Nk, num_heads, hd)
    logits = jnp.einsum("bqhc,bkhc->bhqk", qh, kh) * scale
    w = jax.nn.softmax(logits, axis=-1)
    attn = jnp.einsum("bhqk,bkhc->bqhc", w, vh).reshape(B, Nq, Di)
    attn = attn @ p["wo"] + p["bo"][0]
    x = attn + (q_base if add_residual else 0.0)
    mu = jnp.mean(x, axis=-1, keepdims=True)
    var = jnp.mean((x - mu) ** 2, axis=-1, keepdims=True)
    return (x - mu) * jax.lax.rsqrt(var + eps) * ln["gamma"][0] + ln["beta"][0]


def ref_mlp_ln(p, ln, x, eps=1e-5):
    h = jnp.maximum(x @ p["w1"] + p["b1"][0], 0.0)
    m = h @ p["w2"] + p["b2"][0]
    z = x + m
    mu = jnp.mean(z, axis=-1, keepdims=True)
    var = jnp.mean((z - mu) ** 2, axis=-1, keepdims=True)
    return (z - mu) * jax.lax.rsqrt(var + eps) * ln["gamma"][0] + ln["beta"][0]


# ---------------------------------------------------------------------------
# Shared forward driver (mirrors TwoWayTransformer.forward exactly)
# ---------------------------------------------------------------------------

def two_way_transformer(params, image_embedding, image_pe, queries, query_pe,
                        num_heads, attn_ln_fn, mlp_ln_fn):
    bs, c, h, w, d = image_embedding.shape
    keys = image_embedding.reshape(bs, c, h * w * d).transpose(0, 2, 1)
    key_pe = image_pe.reshape(bs, c, h * w * d).transpose(0, 2, 1)

    for i, lp in enumerate(params["layers"]):
        if i == 0:
            # skip_first_layer_pe: queries = LN(self_attn(q, q, q)), no residual
            queries = attn_ln_fn(lp["self_attn"], lp["norm1"],
                                 queries, None, queries, None, queries,
                                 num_heads, add_residual=False)
        else:
            queries = attn_ln_fn(lp["self_attn"], lp["norm1"],
                                 queries, query_pe, queries, query_pe, queries,
                                 num_heads, add_residual=True)

        # cross attention: tokens -> image
        queries = attn_ln_fn(lp["cross_t2i"], lp["norm2"],
                             queries, query_pe, keys, key_pe, keys,
                             num_heads, add_residual=True)
        # MLP on tokens
        queries = mlp_ln_fn(lp["mlp"], lp["norm3"], queries)
        # cross attention: image -> tokens
        keys = attn_ln_fn(lp["cross_i2t"], lp["norm4"],
                          keys, key_pe, queries, query_pe, queries,
                          num_heads, add_residual=True)

    # final token -> image attention
    queries = attn_ln_fn(params["final_attn"], params["norm_final"],
                         queries, query_pe, keys, key_pe, keys,
                         num_heads, add_residual=True)
    return queries, keys


# ---------------------------------------------------------------------------
# Deterministic parameter initialization (synthetic, PyTorch-like shapes)
# ---------------------------------------------------------------------------

def init_linear(key, din, dout):
    kw, kb = jax.random.split(key)
    bound = 1.0 / float(din) ** 0.5
    w = jax.random.uniform(kw, (din, dout), jnp.float32, -bound, bound)
    b = jax.random.uniform(kb, (1, dout), jnp.float32, -bound, bound)
    return w, b


def init_attention(key, dim, downsample_rate=1):
    di = dim // downsample_rate
    ks = jax.random.split(key, 4)
    wq, bq = init_linear(ks[0], dim, di)
    wk, bk = init_linear(ks[1], dim, di)
    wv, bv = init_linear(ks[2], dim, di)
    wo, bo = init_linear(ks[3], di, dim)
    return dict(wq=wq, bq=bq, wk=wk, bk=bk, wv=wv, bv=bv, wo=wo, bo=bo)


def init_layernorm(dim):
    return dict(gamma=jnp.ones((1, dim), jnp.float32),
                beta=jnp.zeros((1, dim), jnp.float32))


def init_params(key, depth, dim, mlp_dim, attn_downsample):
    layers = []
    for _ in range(depth):
        key, k_sa, k_t2i, k_i2t, k_m1, k_m2 = jax.random.split(key, 6)
        w1, b1 = init_linear(k_m1, dim, mlp_dim)
        w2, b2 = init_linear(k_m2, mlp_dim, dim)
        layers.append(dict(
            self_attn=init_attention(k_sa, dim, 1),
            cross_t2i=init_attention(k_t2i, dim, attn_downsample),
            cross_i2t=init_attention(k_i2t, dim, attn_downsample),
            mlp=dict(w1=w1, b1=b1, w2=w2, b2=b2),
            norm1=init_layernorm(dim), norm2=init_layernorm(dim),
            norm3=init_layernorm(dim), norm4=init_layernorm(dim),
        ))
    key, k_fin = jax.random.split(key)
    return dict(layers=layers,
                final_attn=init_attention(k_fin, dim, attn_downsample),
                norm_final=init_layernorm(dim))


# ---------------------------------------------------------------------------
# Main
# ---------------------------------------------------------------------------

if __name__ == "__main__":
    depth = 2
    embedding_dim = 32
    num_heads = 4
    mlp_dim = 64
    attn_downsample = 2

    B, H, W, D3 = 2, 4, 4, 4      # image volume (channel-first input)
    N_points = 8

    root = jax.random.PRNGKey(0)
    k_params, k_img, k_pe, k_q, k_qpe = jax.random.split(root, 5)
    params = init_params(k_params, depth, embedding_dim, mlp_dim, attn_downsample)

    image_embedding = jax.random.normal(k_img, (B, embedding_dim, H, W, D3), jnp.float32)
    image_pe = jax.random.normal(k_pe, (B, embedding_dim, H, W, D3), jnp.float32)
    queries = jax.random.normal(k_q, (B, N_points, embedding_dim), jnp.float32)
    query_pe = jax.random.normal(k_qpe, (B, N_points, embedding_dim), jnp.float32)

    q_out, k_out = two_way_transformer(
        params, image_embedding, image_pe, queries, query_pe, num_heads,
        pallas_attention_ln, pallas_mlp_ln)
    q_out, k_out = jax.block_until_ready((q_out, k_out))

    q_ref, k_ref = two_way_transformer(
        params, image_embedding, image_pe, queries, query_pe, num_heads,
        ref_attention_ln, ref_mlp_ln)
    q_ref, k_ref = jax.block_until_ready((q_ref, k_ref))

    # tolerance accounts for the approximate (EUP) reciprocal in the softmax epilogue
    np.testing.assert_allclose(np.asarray(q_out), np.asarray(q_ref), rtol=5e-3, atol=5e-3)
    np.testing.assert_allclose(np.asarray(k_out), np.asarray(k_ref), rtol=5e-3, atol=5e-3)
    print("KERNEL_OK")
</pallas_src>

<mosaic_0001>
module attributes {stable_mosaic.version = 11 : i64} {
  func.func @_fused_attn_ln_kernel(%arg0: i32, %arg1: i32, %arg2: i32, %arg3: memref<1x8x32xf32, #tpu.memory_space<vmem>>, %arg4: memref<1x8x32xf32, #tpu.memory_space<vmem>>, %arg5: memref<1x8x32xf32, #tpu.memory_space<vmem>>, %arg6: memref<32x32xf32, #tpu.memory_space<vmem>>, %arg7: memref<1x32xf32, #tpu.memory_space<vmem>>, %arg8: memref<32x32xf32, #tpu.memory_space<vmem>>, %arg9: memref<1x32xf32, #tpu.memory_space<vmem>>, %arg10: memref<32x32xf32, #tpu.memory_space<vmem>>, %arg11: memref<1x32xf32, #tpu.memory_space<vmem>>, %arg12: memref<32x32xf32, #tpu.memory_space<vmem>>, %arg13: memref<1x32xf32, #tpu.memory_space<vmem>>, %arg14: memref<1x32xf32, #tpu.memory_space<vmem>>, %arg15: memref<1x32xf32, #tpu.memory_space<vmem>>, %arg16: memref<1x8x32xf32, #tpu.memory_space<vmem>>, %arg17: memref<8x32xf32, #tpu.memory_space<vmem>>, %arg18: memref<8x4xf32, #tpu.memory_space<vmem>>, %arg19: memref<8x4xf32, #tpu.memory_space<vmem>>, %arg20: memref<8x32xf32, #tpu.memory_space<vmem>>) attributes {dimension_semantics = [#tpu.dimension_semantics<parallel>, #tpu.dimension_semantics<parallel>, #tpu.dimension_semantics<arbitrary>], iteration_bounds = array<i64: 2, 1, 1>, scalar_prefetch = 0 : i64, scratch_operands = 4 : i64, tpu.core_type = #tpu.core_type<tc>, window_params = [{transform_indices = @transform_0, window_bounds = array<i64: 1, 8, 32>}, {transform_indices = @transform_1, window_bounds = array<i64: 1, 8, 32>}, {transform_indices = @transform_2, window_bounds = array<i64: 1, 8, 32>}, {pipeline_mode = #tpu.pipeline_mode<synchronous>, transform_indices = @transform_3, window_bounds = array<i64: 32, 32>}, {pipeline_mode = #tpu.pipeline_mode<synchronous>, transform_indices = @transform_4, window_bounds = array<i64: 1, 32>}, {pipeline_mode = #tpu.pipeline_mode<synchronous>, transform_indices = @transform_5, window_bounds = array<i64: 32, 32>}, {pipeline_mode = #tpu.pipeline_mode<synchronous>, transform_indices = @transform_6, window_bounds = array<i64: 1, 32>}, {pipeline_mode = #tpu.pipeline_mode<synchronous>, transform_indices = @transform_7, window_bounds = array<i64: 32, 32>}, {pipeline_mode = #tpu.pipeline_mode<synchronous>, transform_indices = @transform_8, window_bounds = array<i64: 1, 32>}, {pipeline_mode = #tpu.pipeline_mode<synchronous>, transform_indices = @transform_9, window_bounds = array<i64: 32, 32>}, {pipeline_mode = #tpu.pipeline_mode<synchronous>, transform_indices = @transform_10, window_bounds = array<i64: 1, 32>}, {pipeline_mode = #tpu.pipeline_mode<synchronous>, transform_indices = @transform_11, window_bounds = array<i64: 1, 32>}, {pipeline_mode = #tpu.pipeline_mode<synchronous>, transform_indices = @transform_12, window_bounds = array<i64: 1, 32>}, {transform_indices = @transform_13, window_bounds = array<i64: 1, 8, 32>}]} {
    %c0_i32 = arith.constant 0 : i32
    %0 = arith.cmpi eq, %arg2, %c0_i32 : i32
    %1 = arith.extui %0 : i1 to i32
    %c0_i32_0 = arith.constant 0 : i32
    %2 = arith.cmpi ne, %1, %c0_i32_0 : i32
    scf.if %2 {
      %c0_77 = arith.constant 0 : index
      %c0_78 = arith.constant 0 : index
      %c0_79 = arith.constant 0 : index
      %125 = vector.load %arg3[%c0_77, %c0_78, %c0_79] : memref<1x8x32xf32, #tpu.memory_space<vmem>>, vector<1x8x32xf32>
      %126 = vector.shape_cast %125 : vector<1x8x32xf32> to vector<8x32xf32>
      %c0_80 = arith.constant 0 : index
      %c0_81 = arith.constant 0 : index
      %127 = vector.load %arg6[%c0_80, %c0_81] : memref<32x32xf32, #tpu.memory_space<vmem>>, vector<32x32xf32>
      %cst_82 = arith.constant dense<0.000000e+00> : vector<8x32xf32>
      %128 = tpu.matmul %126, %127, %cst_82 {dimension_numbers = #tpu.dot_dimension_numbers<[1], [0], [0], [1], [0, 0, 1, 1], [], []>} : vector<8x32xf32>, vector<32x32xf32>, vector<8x32xf32> -> vector<8x32xf32>
      %c0_83 = arith.constant 0 : index
      %c0_84 = arith.constant 0 : index
      %129 = vector.load %arg7[%c0_83, %c0_84] : memref<1x32xf32, #tpu.memory_space<vmem>>, vector<1x32xf32>
      %130 = vector.broadcast %129 : vector<1x32xf32> to vector<8x32xf32>
      %131 = arith.addf %128, %130 : vector<8x32xf32>
      %c0_85 = arith.constant 0 : index
      %c0_86 = arith.constant 0 : index
      %132 = vector.load %arg17[%c0_85, %c0_86] : memref<8x32xf32, #tpu.memory_space<vmem>>, vector<8x32xf32>
      tpu.vector_store %arg17[%c0_85, %c0_86], %131 {strides = array<i32>} : memref<8x32xf32, #tpu.memory_space<vmem>>, vector<8x32xf32>,
      %cst_87 = arith.constant 0xFF800000 : f32
      %133 = vector.broadcast %cst_87 : f32 to vector<8x4xf32>
      %c0_88 = arith.constant 0 : index
      %c0_89 = arith.constant 0 : index
      %134 = vector.load %arg18[%c0_88, %c0_89] : memref<8x4xf32, #tpu.memory_space<vmem>>, vector<8x4xf32>
      tpu.vector_store %arg18[%c0_88, %c0_89], %133 {strides = array<i32>} : memref<8x4xf32, #tpu.memory_space<vmem>>, vector<8x4xf32>,
      %cst_90 = arith.constant 0.000000e+00 : f32
      %135 = vector.broadcast %cst_90 : f32 to vector<8x4xf32>
      %c0_91 = arith.constant 0 : index
      %c0_92 = arith.constant 0 : index
      %136 = vector.load %arg19[%c0_91, %c0_92] : memref<8x4xf32, #tpu.memory_space<vmem>>, vector<8x4xf32>
      tpu.vector_store %arg19[%c0_91, %c0_92], %135 {strides = array<i32>} : memref<8x4xf32, #tpu.memory_space<vmem>>, vector<8x4xf32>,
      %cst_93 = arith.constant 0.000000e+00 : f32
      %137 = vector.broadcast %cst_93 : f32 to vector<8x32xf32>
      %c0_94 = arith.constant 0 : index
      %c0_95 = arith.constant 0 : index
      %138 = vector.load %arg20[%c0_94, %c0_95] : memref<8x32xf32, #tpu.memory_space<vmem>>, vector<8x32xf32>
      tpu.vector_store %arg20[%c0_94, %c0_95], %137 {strides = array<i32>} : memref<8x32xf32, #tpu.memory_space<vmem>>, vector<8x32xf32>,
    } else {
    }
    %c0 = arith.constant 0 : index
    %c0_1 = arith.constant 0 : index
    %c0_2 = arith.constant 0 : index
    %3 = vector.load %arg4[%c0, %c0_1, %c0_2] : memref<1x8x32xf32, #tpu.memory_space<vmem>>, vector<1x8x32xf32>
    %4 = vector.shape_cast %3 : vector<1x8x32xf32> to vector<8x32xf32>
    %c0_3 = arith.constant 0 : index
    %c0_4 = arith.constant 0 : index
    %5 = vector.load %arg8[%c0_3, %c0_4] : memref<32x32xf32, #tpu.memory_space<vmem>>, vector<32x32xf32>
    %cst = arith.constant dense<0.000000e+00> : vector<8x32xf32>
    %6 = tpu.matmul %4, %5, %cst {dimension_numbers = #tpu.dot_dimension_numbers<[1], [0], [0], [1], [0, 0, 1, 1], [], []>} : vector<8x32xf32>, vector<32x32xf32>, vector<8x32xf32> -> vector<8x32xf32>
    %c0_5 = arith.constant 0 : index
    %c0_6 = arith.constant 0 : index
    %7 = vector.load %arg9[%c0_5, %c0_6] : memref<1x32xf32, #tpu.memory_space<vmem>>, vector<1x32xf32>
    %8 = vector.broadcast %7 : vector<1x32xf32> to vector<8x32xf32>
    %9 = arith.addf %6, %8 : vector<8x32xf32>
    %c0_7 = arith.constant 0 : index
    %c0_8 = arith.constant 0 : index
    %c0_9 = arith.constant 0 : index
    %10 = vector.load %arg5[%c0_7, %c0_8, %c0_9] : memref<1x8x32xf32, #tpu.memory_space<vmem>>, vector<1x8x32xf32>
    %11 = vector.shape_cast %10 : vector<1x8x32xf32> to vector<8x32xf32>
    %c0_10 = arith.constant 0 : index
    %c0_11 = arith.constant 0 : index
    %12 = vector.load %arg10[%c0_10, %c0_11] : memref<32x32xf32, #tpu.memory_space<vmem>>, vector<32x32xf32>
    %cst_12 = arith.constant dense<0.000000e+00> : vector<8x32xf32>
    %13 = tpu.matmul %11, %12, %cst_12 {dimension_numbers = #tpu.dot_dimension_numbers<[1], [0], [0], [1], [0, 0, 1, 1], [], []>} : vector<8x32xf32>, vector<32x32xf32>, vector<8x32xf32> -> vector<8x32xf32>
    %c0_13 = arith.constant 0 : index
    %c0_14 = arith.constant 0 : index
    %14 = vector.load %arg11[%c0_13, %c0_14] : memref<1x32xf32, #tpu.memory_space<vmem>>, vector<1x32xf32>
    %15 = vector.broadcast %14 : vector<1x32xf32> to vector<8x32xf32>
    %16 = arith.addf %13, %15 : vector<8x32xf32>
    %c0_15 = arith.constant 0 : index
    %c0_16 = arith.constant 0 : index
    %17 = vector.load %arg17[%c0_15, %c0_16] : memref<8x32xf32, #tpu.memory_space<vmem>>, vector<8x32xf32>
    %18 = vector.extract_strided_slice %17 {offsets = [0, 0], sizes = [8, 8], strides = [1, 1]} : vector<8x32xf32> to vector<8x8xf32>
    %19 = vector.extract_strided_slice %9 {offsets = [0, 0], sizes = [8, 8], strides = [1, 1]} : vector<8x32xf32> to vector<8x8xf32>
    %cst_17 = arith.constant dense<0.000000e+00> : vector<8x8xf32>
    %20 = tpu.matmul %18, %19, %cst_17 {dimension_numbers = #tpu.dot_dimension_numbers<[1], [1], [0], [0], [0, 0, 1, 0], [], []>} : vector<8x8xf32>, vector<8x8xf32>, vector<8x8xf32> -> vector<8x8xf32>
    %c0_18 = arith.constant 0 : index
    %c0_19 = arith.constant 0 : index
    %21 = vector.load %arg18[%c0_18, %c0_19] : memref<8x4xf32, #tpu.memory_space<vmem>>, vector<8x1xf32>
    %cst_20 = arith.constant dense<0xFF800000> : vector<8xf32>
    %22 = vector.multi_reduction <maximumf>, %20, %cst_20 [1] : vector<8x8xf32> to vector<8xf32>
    %23 = vector.shape_cast %22 : vector<8xf32> to vector<8x1xf32>
    %24 = arith.maximumf %21, %23 : vector<8x1xf32>
    %25 = arith.subf %21, %24 : vector<8x1xf32>
    %26 = math.exp %25 : vector<8x1xf32>
    %27 = vector.broadcast %24 : vector<8x1xf32> to vector<8x8xf32>
    %28 = arith.subf %20, %27 : vector<8x8xf32>
    %29 = math.exp %28 : vector<8x8xf32>
    %c0_21 = arith.constant 0 : index
    %c0_22 = arith.constant 0 : index
    %30 = vector.load %arg19[%c0_21, %c0_22] : memref<8x4xf32, #tpu.memory_space<vmem>>, vector<8x1xf32>
    %31 = arith.mulf %26, %30 : vector<8x1xf32>
    %cst_23 = arith.constant dense<0.000000e+00> : vector<8xf32>
    %32 = vector.multi_reduction <add>, %29, %cst_23 [1] : vector<8x8xf32> to vector<8xf32>
    %33 = vector.shape_cast %32 : vector<8xf32> to vector<8x1xf32>
    %34 = arith.addf %31, %33 : vector<8x1xf32>
    %c0_24 = arith.constant 0 : index
    %c0_25 = arith.constant 0 : index
    %35 = vector.load %arg19[%c0_24, %c0_25] : memref<8x4xf32, #tpu.memory_space<vmem>>, vector<8x1xf32>
    tpu.vector_store %arg19[%c0_24, %c0_25], %34 {strides = array<i32>} : memref<8x4xf32, #tpu.memory_space<vmem>>, vector<8x1xf32>,
    %c0_26 = arith.constant 0 : index
    %c0_27 = arith.constant 0 : index
    %36 = vector.load %arg20[%c0_26, %c0_27] : memref<8x32xf32, #tpu.memory_space<vmem>>, vector<8x8xf32>
    %37 = vector.broadcast %26 : vector<8x1xf32> to vector<8x8xf32>
    %38 = arith.mulf %37, %36 : vector<8x8xf32>
    %39 = vector.extract_strided_slice %16 {offsets = [0, 0], sizes = [8, 8], strides = [1, 1]} : vector<8x32xf32> to vector<8x8xf32>
    %cst_28 = arith.constant dense<0.000000e+00> : vector<8x8xf32>
    %40 = tpu.matmul %29, %39, %cst_28 {dimension_numbers = #tpu.dot_dimension_numbers<[1], [0], [0], [1], [0, 0, 1, 1], [], []>} : vector<8x8xf32>, vector<8x8xf32>, vector<8x8xf32> -> vector<8x8xf32>
    %41 = arith.addf %38, %40 : vector<8x8xf32>
    %c0_29 = arith.constant 0 : index
    %c0_30 = arith.constant 0 : index
    %42 = vector.load %arg20[%c0_29, %c0_30] : memref<8x32xf32, #tpu.memory_space<vmem>>, vector<8x8xf32>
    tpu.vector_store %arg20[%c0_29, %c0_30], %41 {strides = array<i32>} : memref<8x32xf32, #tpu.memory_space<vmem>>, vector<8x8xf32>,
    %c0_31 = arith.constant 0 : index
    %c0_32 = arith.constant 0 : index
    %43 = vector.load %arg18[%c0_31, %c0_32] : memref<8x4xf32, #tpu.memory_space<vmem>>, vector<8x1xf32>
    tpu.vector_store %arg18[%c0_31, %c0_32], %24 {strides = array<i32>} : memref<8x4xf32, #tpu.memory_space<vmem>>, vector<8x1xf32>,
    %44 = vector.extract_strided_slice %17 {offsets = [0, 8], sizes = [8, 8], strides = [1, 1]} : vector<8x32xf32> to vector<8x8xf32>
    %45 = vector.extract_strided_slice %9 {offsets = [0, 8], sizes = [8, 8], strides = [1, 1]} : vector<8x32xf32> to vector<8x8xf32>
    %cst_33 = arith.constant dense<0.000000e+00> : vector<8x8xf32>
    %46 = tpu.matmul %44, %45, %cst_33 {dimension_numbers = #tpu.dot_dimension_numbers<[1], [1], [0], [0], [0, 0, 1, 0], [], []>} : vector<8x8xf32>, vector<8x8xf32>, vector<8x8xf32> -> vector<8x8xf32>
    %c0_34 = arith.constant 0 : index
    %c1 = arith.constant 1 : index
    %47 = vector.load %arg18[%c0_34, %c1] : memref<8x4xf32, #tpu.memory_space<vmem>>, vector<8x1xf32>
    %cst_35 = arith.constant dense<0xFF800000> : vector<8xf32>
    %48 = vector.multi_reduction <maximumf>, %46, %cst_35 [1] : vector<8x8xf32> to vector<8xf32>
    %49 = vector.shape_cast %48 : vector<8xf32> to vector<8x1xf32>
    %50 = arith.maximumf %47, %49 : vector<8x1xf32>
    %51 = arith.subf %47, %50 : vector<8x1xf32>
    %52 = math.exp %51 : vector<8x1xf32>
    %53 = vector.broadcast %50 : vector<8x1xf32> to vector<8x8xf32>
    %54 = arith.subf %46, %53 : vector<8x8xf32>
    %55 = math.exp %54 : vector<8x8xf32>
    %c0_36 = arith.constant 0 : index
    %c1_37 = arith.constant 1 : index
    %56 = vector.load %arg19[%c0_36, %c1_37] : memref<8x4xf32, #tpu.memory_space<vmem>>, vector<8x1xf32>
    %57 = arith.mulf %52, %56 : vector<8x1xf32>
    %cst_38 = arith.constant dense<0.000000e+00> : vector<8xf32>
    %58 = vector.multi_reduction <add>, %55, %cst_38 [1] : vector<8x8xf32> to vector<8xf32>
    %59 = vector.shape_cast %58 : vector<8xf32> to vector<8x1xf32>
    %60 = arith.addf %57, %59 : vector<8x1xf32>
    %c0_39 = arith.constant 0 : index
    %c1_40 = arith.constant 1 : index
    %61 = vector.load %arg19[%c0_39, %c1_40] : memref<8x4xf32, #tpu.memory_space<vmem>>, vector<8x1xf32>
    tpu.vector_store %arg19[%c0_39, %c1_40], %60 {strides = array<i32>} : memref<8x4xf32, #tpu.memory_space<vmem>>, vector<8x1xf32>,
    %c0_41 = arith.constant 0 : index
    %c8 = arith.constant 8 : index
    %62 = vector.load %arg20[%c0_41, %c8] : memref<8x32xf32, #tpu.memory_space<vmem>>, vector<8x8xf32>
    %63 = vector.broadcast %52 : vector<8x1xf32> to vector<8x8xf32>
    %64 = arith.mulf %63, %62 : vector<8x8xf32>
    %65 = vector.extract_strided_slice %16 {offsets = [0, 8], sizes = [8, 8], strides = [1, 1]} : vector<8x32xf32> to vector<8x8xf32>
    %cst_42 = arith.constant dense<0.000000e+00> : vector<8x8xf32>
    %66 = tpu.matmul %55, %65, %cst_42 {dimension_numbers = #tpu.dot_dimension_numbers<[1], [0], [0], [1], [0, 0, 1, 1], [], []>} : vector<8x8xf32>, vector<8x8xf32>, vector<8x8xf32> -> vector<8x8xf32>
    %67 = arith.addf %64, %66 : vector<8x8xf32>
    %c0_43 = arith.constant 0 : index
    %c8_44 = arith.constant 8 : index
    %68 = vector.load %arg20[%c0_43, %c8_44] : memref<8x32xf32, #tpu.memory_space<vmem>>, vector<8x8xf32>
    tpu.vector_store %arg20[%c0_43, %c8_44], %67 {strides = array<i32>} : memref<8x32xf32, #tpu.memory_space<vmem>>, vector<8x8xf32>,
    %c0_45 = arith.constant 0 : index
    %c1_46 = arith.constant 1 : index
    %69 = vector.load %arg18[%c0_45, %c1_46] : memref<8x4xf32, #tpu.memory_space<vmem>>, vector<8x1xf32>
    tpu.vector_store %arg18[%c0_45, %c1_46], %50 {strides = array<i32>} : memref<8x4xf32, #tpu.memory_space<vmem>>, vector<8x1xf32>,
    %70 = vector.extract_strided_slice %17 {offsets = [0, 16], sizes = [8, 8], strides = [1, 1]} : vector<8x32xf32> to vector<8x8xf32>
    %71 = vector.extract_strided_slice %9 {offsets = [0, 16], sizes = [8, 8], strides = [1, 1]} : vector<8x32xf32> to vector<8x8xf32>
    %cst_47 = arith.constant dense<0.000000e+00> : vector<8x8xf32>
    %72 = tpu.matmul %70, %71, %cst_47 {dimension_numbers = #tpu.dot_dimension_numbers<[1], [1], [0], [0], [0, 0, 1, 0], [], []>} : vector<8x8xf32>, vector<8x8xf32>, vector<8x8xf32> -> vector<8x8xf32>
    %c0_48 = arith.constant 0 : index
    %c2 = arith.constant 2 : index
    %73 = vector.load %arg18[%c0_48, %c2] : memref<8x4xf32, #tpu.memory_space<vmem>>, vector<8x1xf32>
    %cst_49 = arith.constant dense<0xFF800000> : vector<8xf32>
    %74 = vector.multi_reduction <maximumf>, %72, %cst_49 [1] : vector<8x8xf32> to vector<8xf32>
    %75 = vector.shape_cast %74 : vector<8xf32> to vector<8x1xf32>
    %76 = arith.maximumf %73, %75 : vector<8x1xf32>
    %77 = arith.subf %73, %76 : vector<8x1xf32>
    %78 = math.exp %77 : vector<8x1xf32>
    %79 = vector.broadcast %76 : vector<8x1xf32> to vector<8x8xf32>
    %80 = arith.subf %72, %79 : vector<8x8xf32>
    %81 = math.exp %80 : vector<8x8xf32>
    %c0_50 = arith.constant 0 : index
    %c2_51 = arith.constant 2 : index
    %82 = vector.load %arg19[%c0_50, %c2_51] : memref<8x4xf32, #tpu.memory_space<vmem>>, vector<8x1xf32>
    %83 = arith.mulf %78, %82 : vector<8x1xf32>
    %cst_52 = arith.constant dense<0.000000e+00> : vector<8xf32>
    %84 = vector.multi_reduction <add>, %81, %cst_52 [1] : vector<8x8xf32> to vector<8xf32>
    %85 = vector.shape_cast %84 : vector<8xf32> to vector<8x1xf32>
    %86 = arith.addf %83, %85 : vector<8x1xf32>
    %c0_53 = arith.constant 0 : index
    %c2_54 = arith.constant 2 : index
    %87 = vector.load %arg19[%c0_53, %c2_54] : memref<8x4xf32, #tpu.memory_space<vmem>>, vector<8x1xf32>
    tpu.vector_store %arg19[%c0_53, %c2_54], %86 {strides = array<i32>} : memref<8x4xf32, #tpu.memory_space<vmem>>, vector<8x1xf32>,
    %c0_55 = arith.constant 0 : index
    %c16 = arith.constant 16 : index
    %88 = vector.load %arg20[%c0_55, %c16] : memref<8x32xf32, #tpu.memory_space<vmem>>, vector<8x8xf32>
    %89 = vector.broadcast %78 : vector<8x1xf32> to vector<8x8xf32>
    %90 = arith.mulf %89, %88 : vector<8x8xf32>
    %91 = vector.extract_strided_slice %16 {offsets = [0, 16], sizes = [8, 8], strides = [1, 1]} : vector<8x32xf32> to vector<8x8xf32>
    %cst_56 = arith.constant dense<0.000000e+00> : vector<8x8xf32>
    %92 = tpu.matmul %81, %91, %cst_56 {dimension_numbers = #tpu.dot_dimension_numbers<[1], [0], [0], [1], [0, 0, 1, 1], [], []>} : vector<8x8xf32>, vector<8x8xf32>, vector<8x8xf32> -> vector<8x8xf32>
    %93 = arith.addf %90, %92 : vector<8x8xf32>
    %c0_57 = arith.constant 0 : index
    %c16_58 = arith.constant 16 : index
    %94 = vector.load %arg20[%c0_57, %c16_58] : memref<8x32xf32, #tpu.memory_space<vmem>>, vector<8x8xf32>
    tpu.vector_store %arg20[%c0_57, %c16_58], %93 {strides = array<i32>} : memref<8x32xf32, #tpu.memory_space<vmem>>, vector<8x8xf32>,
    %c0_59 = arith.constant 0 : index
    %c2_60 = arith.constant 2 : index
    %95 = vector.load %arg18[%c0_59, %c2_60] : memref<8x4xf32, #tpu.memory_space<vmem>>, vector<8x1xf32>
    tpu.vector_store %arg18[%c0_59, %c2_60], %76 {strides = array<i32>} : memref<8x4xf32, #tpu.memory_space<vmem>>, vector<8x1xf32>,
    %96 = vector.extract_strided_slice %17 {offsets = [0, 24], sizes = [8, 8], strides = [1, 1]} : vector<8x32xf32> to vector<8x8xf32>
    %97 = vector.extract_strided_slice %9 {offsets = [0, 24], sizes = [8, 8], strides = [1, 1]} : vector<8x32xf32> to vector<8x8xf32>
    %cst_61 = arith.constant dense<0.000000e+00> : vector<8x8xf32>
    %98 = tpu.matmul %96, %97, %cst_61 {dimension_numbers = #tpu.dot_dimension_numbers<[1], [1], [0], [0], [0, 0, 1, 0], [], []>} : vector<8x8xf32>, vector<8x8xf32>, vector<8x8xf32> -> vector<8x8xf32>
    %c0_62 = arith.constant 0 : index
    %c3 = arith.constant 3 : index
    %99 = vector.load %arg18[%c0_62, %c3] : memref<8x4xf32, #tpu.memory_space<vmem>>, vector<8x1xf32>
    %cst_63 = arith.constant dense<0xFF800000> : vector<8xf32>
    %100 = vector.multi_reduction <maximumf>, %98, %cst_63 [1] : vector<8x8xf32> to vector<8xf32>
    %101 = vector.shape_cast %100 : vector<8xf32> to vector<8x1xf32>
    %102 = arith.maximumf %99, %101 : vector<8x1xf32>
    %103 = arith.subf %99, %102 : vector<8x1xf32>
    %104 = math.exp %103 : vector<8x1xf32>
    %105 = vector.broadcast %102 : vector<8x1xf32> to vector<8x8xf32>
    %106 = arith.subf %98, %105 : vector<8x8xf32>
    %107 = math.exp %106 : vector<8x8xf32>
    %c0_64 = arith.constant 0 : index
    %c3_65 = arith.constant 3 : index
    %108 = vector.load %arg19[%c0_64, %c3_65] : memref<8x4xf32, #tpu.memory_space<vmem>>, vector<8x1xf32>
    %109 = arith.mulf %104, %108 : vector<8x1xf32>
    %cst_66 = arith.constant dense<0.000000e+00> : vector<8xf32>
    %110 = vector.multi_reduction <add>, %107, %cst_66 [1] : vector<8x8xf32> to vector<8xf32>
    %111 = vector.shape_cast %110 : vector<8xf32> to vector<8x1xf32>
    %112 = arith.addf %109, %111 : vector<8x1xf32>
    %c0_67 = arith.constant 0 : index
    %c3_68 = arith.constant 3 : index
    %113 = vector.load %arg19[%c0_67, %c3_68] : memref<8x4xf32, #tpu.memory_space<vmem>>, vector<8x1xf32>
    tpu.vector_store %arg19[%c0_67, %c3_68], %112 {strides = array<i32>} : memref<8x4xf32, #tpu.memory_space<vmem>>, vector<8x1xf32>,
    %c0_69 = arith.constant 0 : index
    %c24 = arith.constant 24 : index
    %114 = vector.load %arg20[%c0_69, %c24] : memref<8x32xf32, #tpu.memory_space<vmem>>, vector<8x8xf32>
    %115 = vector.broadcast %104 : vector<8x1xf32> to vector<8x8xf32>
    %116 = arith.mulf %115, %114 : vector<8x8xf32>
    %117 = vector.extract_strided_slice %16 {offsets = [0, 24], sizes = [8, 8], strides = [1, 1]} : vector<8x32xf32> to vector<8x8xf32>
    %cst_70 = arith.constant dense<0.000000e+00> : vector<8x8xf32>
    %118 = tpu.matmul %107, %117, %cst_70 {dimension_numbers = #tpu.dot_dimension_numbers<[1], [0], [0], [1], [0, 0, 1, 1], [], []>} : vector<8x8xf32>, vector<8x8xf32>, vector<8x8xf32> -> vector<8x8xf32>
    %119 = arith.addf %116, %118 : vector<8x8xf32>
    %c0_71 = arith.constant 0 : index
    %c24_72 = arith.constant 24 : index
    %120 = vector.load %arg20[%c0_71, %c24_72] : memref<8x32xf32, #tpu.memory_space<vmem>>, vector<8x8xf32>
    tpu.vector_store %arg20[%c0_71, %c24_72], %119 {strides = array<i32>} : memref<8x32xf32, #tpu.memory_space<vmem>>, vector<8x8xf32>,
    %c0_73 = arith.constant 0 : index
    %c3_74 = arith.constant 3 : index
    %121 = vector.load %arg18[%c0_73, %c3_74] : memref<8x4xf32, #tpu.memory_space<vmem>>, vector<8x1xf32>
    tpu.vector_store %arg18[%c0_73, %c3_74], %102 {strides = array<i32>} : memref<8x4xf32, #tpu.memory_space<vmem>>, vector<8x1xf32>,
    %c0_i32_75 = arith.constant 0 : i32
    %122 = arith.cmpi eq, %arg2, %c0_i32_75 : i32
    %123 = arith.extui %122 : i1 to i32
    %c0_i32_76 = arith.constant 0 : i32
    %124 = arith.cmpi ne, %123, %c0_i32_76 : i32
    scf.if %124 {
      %c0_77 = arith.constant 0 : index
      %c0_78 = arith.constant 0 : index
      %125 = vector.load %arg19[%c0_77, %c0_78] : memref<8x4xf32, #tpu.memory_space<vmem>>, vector<8x4xf32>
      %126 = tpu.reciprocal %125 {approx = true} : vector<8x4xf32> -> vector<8x4xf32>
      %c0_79 = arith.constant 0 : index
      %c0_80 = arith.constant 0 : index
      %127 = vector.load %arg20[%c0_79, %c0_80] : memref<8x32xf32, #tpu.memory_space<vmem>>, vector<8x32xf32>
      %128 = vector.shape_cast %127 : vector<8x32xf32> to vector<8x4x8xf32>
      %129 = vector.shape_cast %126 : vector<8x4xf32> to vector<8x4x1xf32>
      %130 = vector.broadcast %129 : vector<8x4x1xf32> to vector<8x4x8xf32>
      %131 = arith.mulf %128, %130 : vector<8x4x8xf32>
      %132 = vector.shape_cast %131 : vector<8x4x8xf32> to vector<8x32xf32>
      %c0_81 = arith.constant 0 : index
      %c0_82 = arith.constant 0 : index
      %133 = vector.load %arg12[%c0_81, %c0_82] : memref<32x32xf32, #tpu.memory_space<vmem>>, vector<32x32xf32>
      %cst_83 = arith.constant dense<0.000000e+00> : vector<8x32xf32>
      %134 = tpu.matmul %132, %133, %cst_83 {dimension_numbers = #tpu.dot_dimension_numbers<[1], [0], [0], [1], [0, 0, 1, 1], [], []>} : vector<8x32xf32>, vector<32x32xf32>, vector<8x32xf32> -> vector<8x32xf32>
      %c0_84 = arith.constant 0 : index
      %c0_85 = arith.constant 0 : index
      %135 = vector.load %arg13[%c0_84, %c0_85] : memref<1x32xf32, #tpu.memory_space<vmem>>, vector<1x32xf32>
      %136 = vector.broadcast %135 : vector<1x32xf32> to vector<8x32xf32>
      %137 = arith.addf %134, %136 : vector<8x32xf32>
      %cst_86 = arith.constant dense<0.000000e+00> : vector<8xf32>
      %138 = vector.multi_reduction <add>, %137, %cst_86 [1] : vector<8x32xf32> to vector<8xf32>
      %139 = vector.shape_cast %138 : vector<8xf32> to vector<8x1xf32>
      %cst_87 = arith.constant 3.200000e+01 : f32
      %140 = vector.broadcast %cst_87 : f32 to vector<8x1xf32>
      %141 = arith.divf %139, %140 : vector<8x1xf32>
      %142 = vector.broadcast %141 : vector<8x1xf32> to vector<8x32xf32>
      %143 = arith.subf %137, %142 : vector<8x32xf32>
      %144 = arith.mulf %143, %143 : vector<8x32xf32>
      %cst_88 = arith.constant dense<0.000000e+00> : vector<8xf32>
      %145 = vector.multi_reduction <add>, %144, %cst_88 [1] : vector<8x32xf32> to vector<8xf32>
      %146 = vector.shape_cast %145 : vector<8xf32> to vector<8x1xf32>
      %cst_89 = arith.constant 3.200000e+01 : f32
      %147 = vector.broadcast %cst_89 : f32 to vector<8x1xf32>
      %148 = arith.divf %146, %147 : vector<8x1xf32>
      %cst_90 = arith.constant 9.99999974E-6 : f32
      %149 = vector.broadcast %cst_90 : f32 to vector<8x1xf32>
      %150 = arith.addf %148, %149 : vector<8x1xf32>
      %151 = math.rsqrt %150 : vector<8x1xf32>
      %152 = vector.broadcast %151 : vector<8x1xf32> to vector<8x32xf32>
      %153 = arith.mulf %143, %152 : vector<8x32xf32>
      %c0_91 = arith.constant 0 : index
      %c0_92 = arith.constant 0 : index
      %154 = vector.load %arg14[%c0_91, %c0_92] : memref<1x32xf32, #tpu.memory_space<vmem>>, vector<1x32xf32>
      %155 = vector.broadcast %154 : vector<1x32xf32> to vector<8x32xf32>
      %156 = arith.mulf %153, %155 : vector<8x32xf32>
      %c0_93 = arith.constant 0 : index
      %c0_94 = arith.constant 0 : index
      %157 = vector.load %arg15[%c0_93, %c0_94] : memref<1x32xf32, #tpu.memory_space<vmem>>, vector<1x32xf32>
      %158 = vector.broadcast %157 : vector<1x32xf32> to vector<8x32xf32>
      %159 = arith.addf %156, %158 : vector<8x32xf32>
      %c0_95 = arith.constant 0 : index
      %c0_96 = arith.constant 0 : index
      %c0_97 = arith.constant 0 : index
      %160 = vector.load %arg16[%c0_95, %c0_96, %c0_97] : memref<1x8x32xf32, #tpu.memory_space<vmem>>, vector<1x8x32xf32>
      %161 = vector.shape_cast %160 : vector<1x8x32xf32> to vector<8x32xf32>
      %162 = vector.shape_cast %159 : vector<8x32xf32> to vector<1x8x32xf32>
      tpu.vector_store %arg16[%c0_95, %c0_96, %c0_97], %162 {strides = array<i32>} : memref<1x8x32xf32, #tpu.memory_space<vmem>>, vector<1x8x32xf32>,
    } else {
    }
    return
  }
  func.func @transform_0(%arg0: i32, %arg1: i32, %arg2: i32) -> (i32, i32, i32) {
    %c0_i32 = arith.constant 0 : i32
    %c0_i32_0 = arith.constant 0 : i32
    return %arg0, %arg1, %c0_i32 : i32, i32, i32
  }
  func.func @transform_1(%arg0: i32, %arg1: i32, %arg2: i32) -> (i32, i32, i32) {
    %c0_i32 = arith.constant 0 : i32
    %c0_i32_0 = arith.constant 0 : i32
    return %arg0, %arg2, %c0_i32 : i32, i32, i32
  }
  func.func @transform_2(%arg0: i32, %arg1: i32, %arg2: i32) -> (i32, i32, i32) {
    %c0_i32 = arith.constant 0 : i32
    %c0_i32_0 = arith.constant 0 : i32
    return %arg0, %arg2, %c0_i32 : i32, i32, i32
  }
  func.func @transform_3(%arg0: i32, %arg1: i32, %arg2: i32) -> (i32, i32) {
    %c0_i32 = arith.constant 0 : i32
    %c0_i32_0 = arith.constant 0 : i32
    %c0_i32_1 = arith.constant 0 : i32
    return %c0_i32, %c0_i32_0 : i32, i32
  }
  func.func @transform_4(%arg0: i32, %arg1: i32, %arg2: i32) -> (i32, i32) {
    %c0_i32 = arith.constant 0 : i32
    %c0_i32_0 = arith.constant 0 : i32
    %c0_i32_1 = arith.constant 0 : i32
    return %c0_i32, %c0_i32_0 : i32, i32
  }
  func.func @transform_5(%arg0: i32, %arg1: i32, %arg2: i32) -> (i32, i32) {
    %c0_i32 = arith.constant 0 : i32
    %c0_i32_0 = arith.constant 0 : i32
    %c0_i32_1 = arith.constant 0 : i32
    return %c0_i32, %c0_i32_0 : i32, i32
  }
  func.func @transform_6(%arg0: i32, %arg1: i32, %arg2: i32) -> (i32, i32) {
    %c0_i32 = arith.constant 0 : i32
    %c0_i32_0 = arith.constant 0 : i32
    %c0_i32_1 = arith.constant 0 : i32
    return %c0_i32, %c0_i32_0 : i32, i32
  }
  func.func @transform_7(%arg0: i32, %arg1: i32, %arg2: i32) -> (i32, i32) {
    %c0_i32 = arith.constant 0 : i32
    %c0_i32_0 = arith.constant 0 : i32
    %c0_i32_1 = arith.constant 0 : i32
    return %c0_i32, %c0_i32_0 : i32, i32
  }
  func.func @transform_8(%arg0: i32, %arg1: i32, %arg2: i32) -> (i32, i32) {
    %c0_i32 = arith.constant 0 : i32
    %c0_i32_0 = arith.constant 0 : i32
    %c0_i32_1 = arith.constant 0 : i32
    return %c0_i32, %c0_i32_0 : i32, i32
  }
  func.func @transform_9(%arg0: i32, %arg1: i32, %arg2: i32) -> (i32, i32) {
    %c0_i32 = arith.constant 0 : i32
    %c0_i32_0 = arith.constant 0 : i32
    %c0_i32_1 = arith.constant 0 : i32
    return %c0_i32, %c0_i32_0 : i32, i32
  }
  func.func @transform_10(%arg0: i32, %arg1: i32, %arg2: i32) -> (i32, i32) {
    %c0_i32 = arith.constant 0 : i32
    %c0_i32_0 = arith.constant 0 : i32
    %c0_i32_1 = arith.constant 0 : i32
    return %c0_i32, %c0_i32_0 : i32, i32
  }
  func.func @transform_11(%arg0: i32, %arg1: i32, %arg2: i32) -> (i32, i32) {
    %c0_i32 = arith.constant 0 : i32
    %c0_i32_0 = arith.constant 0 : i32
    %c0_i32_1 = arith.constant 0 : i32
    return %c0_i32, %c0_i32_0 : i32, i32
  }
  func.func @transform_12(%arg0: i32, %arg1: i32, %arg2: i32) -> (i32, i32) {
    %c0_i32 = arith.constant 0 : i32
    %c0_i32_0 = arith.constant 0 : i32
    %c0_i32_1 = arith.constant 0 : i32
    return %c0_i32, %c0_i32_0 : i32, i32
  }
  func.func @transform_13(%arg0: i32, %arg1: i32, %arg2: i32) -> (i32, i32, i32) {
    %c0_i32 = arith.constant 0 : i32
    %c0_i32_0 = arith.constant 0 : i32
    return %arg0, %arg1, %c0_i32 : i32, i32, i32
  }
}

</mosaic_0001>

<bundles_post_ra>
// kernel: tpu_custom_call.1
= control target key start
LH: loop header
LB: loop body
LE: loop exit
PB: predicated region body
PF: predicated region fallthrough
CT: control target
= control target key end

     0   :  { %s3327_s0 = inlined_call_operand.hbm [shape: f32[2,8,32], index: 0, kind: input, shape index: {}]   ;;  %s3328_s1 = inlined_call_operand.hbm [shape: f32[2,8,32], index: 1, kind: input, shape index: {}]   ;;  %s3329_s2 = inlined_call_operand.hbm [shape: f32[2,8,32], index: 2, kind: input, shape index: {}]   ;;  %s3330_s3 = inlined_call_operand.hbm [shape: f32[32,32], index: 3, kind: input, shape index: {}]   ;;  %s3331_s4 = inlined_call_operand.vmem [shape: f32[1,32], index: 4, kind: input, shape index: {}]   ;;  %s3332_s5 = inlined_call_operand.hbm [shape: f32[32,32], index: 5, kind: input, shape index: {}]   ;;  %s3333_s6 = inlined_call_operand.vmem [shape: f32[1,32], index: 6, kind: input, shape index: {}]   ;;  %s3334_s7 = inlined_call_operand.hbm [shape: f32[32,32], index: 7, kind: input, shape index: {}]   ;;  %s3335_s8 = inlined_call_operand.vmem [shape: f32[1,32], index: 8, kind: input, shape index: {}]   ;;  %s3336_s9 = inlined_call_operand.hbm [shape: f32[32,32], index: 9, kind: input, shape index: {}]   ;;  %s3337_s10 = inlined_call_operand.vmem [shape: f32[1,32], index: 10, kind: input, shape index: {}]   ;;  %s3338_s11 = inlined_call_operand.vmem [shape: f32[1,32], index: 11, kind: input, shape index: {}]   ;;  %s3339_s12 = inlined_call_operand.vmem [shape: f32[1,32], index: 12, kind: input, shape index: {}]   ;;  %s3340_s13 = inlined_call_operand.hbm [shape: f32[2,8,32], index: 13, kind: output, shape index: {}]  }
   0x1   :  { %3359 = sst [smem:[#allocation32_spill]] %s3328_s1 }
   0x2   :  { %3360 = sst [smem:[#allocation33_spill]] %s3330_s3 }
   0x3   :  { %3361 = sst [smem:[#allocation34_spill]] %s3332_s5 }
   0x4   :  { %3362 = sst [smem:[#allocation35_spill]] %s3334_s7 }
   0x5   :  { %3363 = sst [smem:[#allocation36_spill]] %s3338_s11 }
   0x6   :  { %3364 = sst [smem:[#allocation37_spill]] %s3339_s12 }
   0x7   :  { %3365 = sst [smem:[#allocation38_spill]] %s3340_s13 }
   0x8   :  { %18 = vsyncpa [#allocation7], 0 }
   0x9   :  { %20 = vsyncpa [#allocation7 + $0x1], 0 }
   0xa   :  { %21 = vsyncpa [#allocation10], 0 }
   0xb   :  { %23 = vsyncpa [#allocation10 + $0x1], 0 }
   0xc   :  { %24 = vsyncpa [#allocation13], 0 }
   0xd   :  { %25 = vsyncpa [#allocation16], 0 }
   0xe   :  { %26 = vsyncpa [#allocation8], 0 }
   0xf   :  { %28 = vsyncpa [#allocation8 + $0x1], 0  ;;  %s2879_s25 = smov 0   ;;  %s2881_s26 = smov 0  }
  0x10   :  { %s2883_s27 = smov 0   ;;  %s2885_s28 = smov 0  }
  0x11   :  { %s2887_s29 = smov 0   ;;  %s2889_s30 = smov 0  }
  0x12 LB: > { %3366 = sst [smem:[#allocation24_spill]] %s2762_s25  ;;  %s2910_s14 = sadd.s32 4294967295, %s2782_s30   ;;  %s2782_s30 = sphi %s2889_s30, %s34_s30   ;;  %s2778_s29 = sphi %s2887_s29, %s3409_s29   ;;  %s2774_s28 = sphi %s2885_s28, %s3408_s28   ;;  %s2770_s27 = sphi %s2883_s27, %s3412_s27   ;;  %s2766_s26 = sphi %s2881_s26, %s3411_s26   ;;  %s2762_s25 = sphi %s2879_s25, %s3410_s25  }
  0x13   : > { %3367 = sst [smem:[#allocation25_spill]] %s2774_s28  ;;  %p2177_p0 = scmp.ge.s32.totalorder %s2782_s30, 1 }
  0x14   : > { %3368 = sst [smem:[#allocation26_spill]] %s2778_s29  ;;  %p3353_p1 = scmp.eq.s32.totalorder %s2910_s14, 0 }
  0x15   : > { %3369 = sst [smem:[#allocation27_spill]] %s2782_s30  ;;  %p380_p2 = scmp.lt.s32.totalorder %s2782_s30, 3 }
  0x16   : > { %s2784_s16 = smov [#allocation12]   ;;  %s2785_s19 = smov [#allocation15]  }
  0x17   : > { %p2915_p3 = pnand %p2177_p0, %p380_p2  ;;  %s392_s17 = sshll.u32 %s2784_s16, 4  ;;  %s393_s17 = int_to_ptr.vmem [resolvable:$true] %s392_s17 }
  0x18   : > { %s424_s20 = sshll.u32 %s2785_s19, 4  ;;  %s2513_s21 = scalar_lea.vmem %s393_s17, 512  ;;  %s425_s20 = int_to_ptr.vmem [resolvable:$true] %s424_s20 }
  0x19   : > { %p2368_p4 = pneg %p2915_p3  ;;  %p2514_p8 = scmp.ne.s32.totalorder %s393_s17, %s2513_s21 }
  0x1a   : > { %p2521_p11 = scmp.lt.s32.totalorder %s393_s17, %s393_s17  ;;  %p2522_p12 = scmp.lt.s32.totalorder %s2513_s21, %s2513_s21 }
  0x1b   : > { %p2924_p6 = pnand %p2368_p4, %p3353_p1 }
  0x1c   : > { %p2523_p13 = por %p2522_p12, %p2521_p11 }
  0x1d   : > { %p3354_p7 = pneg %p2924_p6 }
  0x1f   : > { %p2516_p9 = pnand %p2514_p8, %p3354_p7 }
  0x21   : > { %p2517_p10 = pneg %p2516_p9 }
  0x23   : > { %p2524_p0 = pnand %p2523_p13, %p2517_p10 }
  0x25   : > { %2527 = shalt.err (!%p2524_p0)
}
  0x26   : > { %s3342_s22 = smov 128   ;;  %s3344_s23 = smov 8  }
  0x27   : > { %s3372_s3 = sld [smem:[#allocation33_spill]]  ;;  %s2539_s19 = scalar_lea.vmem %s425_s20, 512 }
  0x28   : > { %p2540_p2 = scmp.ne.s32.totalorder %s425_s20, %s2539_s19  ;;  %p2547_p9 = scmp.lt.s32.totalorder %s425_s20, %s425_s20 }
  0x29   : > { %p2548_p10 = scmp.lt.s32.totalorder %s2539_s19, %s2539_s19 }
  0x2a   : > { %p2542_p4 = pnand %p2540_p2, %p3354_p7 }
  0x2b   : > { %p2549_p11 = por %p2548_p10, %p2547_p9 }
  0x2c   : > { %p2543_p8 = pneg %p2542_p4 }
  0x2d   : > { %2371 = dma.hbm_to_vmem [thread:$0]  (!%p2924_p6), %s3372_s3, 512, %s393_s17, [#allocation13], %s3342_s22, %s3342_s22, %s3344_s23  }
  0x2e   : > { %p2550_p12 = pnand %p2549_p11, %p2543_p8 }
  0x30   : > { %2553 = shalt.err (!%p2550_p12)
}
  0x31   : > { %s3373_s7 = sld [smem:[#allocation35_spill]]  ;;  %s2176_s17 = sadd.s32 4294967294, %s2782_s30  }
  0x32   : > { %s53_s24 = sadd.s32 1, %s2778_s29  ;;  %s62_s16 = sadd.s32 1, %s2770_s27 }
  0x33   : > { %p55_p13 = scmp.ge.s32.totalorder %s53_s24, 2  ;;  %p69_p0 = scmp.ne.s32.totalorder %s2770_s27, %s2766_s26 }
  0x34   : > { %p70_p2 = scmp.eq.s32.totalorder %s2782_s30, 0  ;;  %p75_p8 = scmp.ne.s32.totalorder %s2766_s26, %s2762_s25 }
  0x35   : > { %s3414_s24 = smov (%p55_p13, %s53_s24), 0  ;;  %p367_p9 = scmp.eq.s32.totalorder %s2910_s14, 1 }
  0x36   : > { %3374 = sst [smem:[#allocation28_spill]] %s3414_s24  ;;  %p2960_p4 = por %p70_p2, %p69_p0 }
  0x37   : > { %2377 = dma.hbm_to_vmem [thread:$0]  (!%p2924_p6), %s3373_s7, 512, %s425_s20, [#allocation16], %s3342_s22, %s3342_s22, %s3344_s23  }
  0x38   : > { %s57_s20 = ssub.s32 %s2778_s29, %s3414_s24  ;;  %p2971_p11 = por %p3353_p1, %p75_p8 }
  0x39   : > { %p60_p10 = scmp.eq.s32.totalorder %s57_s20, 0  ;;  %p2975_p12 = por %p367_p9, %p69_p0 }
  0x3a   : > { %p373_p13 = scmp.eq.s32.totalorder %s2176_s17, 1  ;;  %p2399_p5 = scmp.lt.s32.totalorder %s2782_s30, 2 }
  0x3b   : > { %s3377_s21 = scalar_select %p2975_p12, 1, 0 }
  0x3c   : > { %s2980_s22 = scalar_select %p60_p10, %s2770_s27, %s62_s16  }
  0x3d   : > { %3378 = sst [smem:[#allocation29_spill]] %s3377_s21  ;;  %p2982_p2 = por %p373_p13, %p75_p8 }
  0x3e   : > { %3379 = sst [smem:[#allocation30_spill]] %s2980_s22  ;;  %s3350_s3 = sand.u32 1, %s2770_s27  }
  0x3f   : > { %s3380_s23 = scalar_select %p2982_p2, 1, 0 }
  0x40   : > { %s2989_s7 = sshll.u32 %s2778_s29, 7  ;;  %s2993_s20 = sshll.u32 %s3350_s3, 3 }
  0x41   : > { %3381 = sst [smem:[#allocation31_spill]] %s3380_s23  ;;  %p2997_p0 = pnand %p2399_p5, %p2960_p4 }
  0x42   : > { %s482_s17 = sand.u32 1, %s2782_s30   ;;  %s3383_s1 = sld [smem:[#allocation32_spill]] }
  0x43   : > { %s486_s25 = scalar_lea.vmem [#allocation9], %s2993_s20  ;;  %s3007_s12 = scalar_lea.sflag [#allocation10], %s482_s17 }
  0x44   : > { %s494_s29 = sshll.u32 %s486_s25, 4  ;;  %p3355_p8 = pneg %p2997_p0  ;;  %s495_s29 = int_to_ptr.vmem [resolvable:$true] %s494_s29 }
  0x45   : > { %s2567_s13 = scalar_lea.vmem %s495_s29, 128  ;;  %s2788_s3 = smov [#allocation9]  }
  0x46   : > { %p2568_p9 = scmp.ne.s32.totalorder %s495_s29, %s2567_s13  ;;  %s2572_s11 = sshll.u32 %s2788_s3, 4  ;;  %s2573_s11 = int_to_ptr.vmem [resolvable:$false] %s2572_s11 }
  0x47   : > { %s2574_s30 = scalar_lea.vmem %s2573_s11, 256  ;;  %p2575_p10 = scmp.lt.s32.totalorder %s495_s29, %s2573_s11 }
  0x48   : > { %s492_s23 = scalar_lea.hbm %s3383_s1, %s2989_s7  ;;  %p2570_p5 = pnand %p2568_p9, %p3355_p8 }
  0x49   : > { %p2576_p13 = scmp.lt.s32.totalorder %s2574_s30, %s2567_s13 }
  0x4a   : > { %p2571_p4 = pneg %p2570_p5 }
  0x4b   : > { %p2577_p1 = por %p2576_p13, %p2575_p10 }
  0x4d   : > { %p2578_p7 = pnand %p2577_p1, %p2571_p4 }
  0x4f   : > { %2581 = shalt.err (!%p2578_p7)
}
  0x50   : > { %2387 = dma.hbm_to_vmem [thread:$0]  (!%p2997_p0), %s492_s23, 128, %s495_s29, %s3007_s12  }
  0x51   : > { %s2789_s25 = smov [#allocation14]   ;;  %s2790_s17 = smov [#allocation17]  }
  0x52   : > { %s408_s22 = sshll.u32 %s2789_s25, 4  ;;  %s440_s16 = sshll.u32 %s2790_s17, 4  ;;  %s409_s22 = int_to_ptr.vmem [resolvable:$true] %s408_s22  ;;  %s441_s16 = int_to_ptr.vmem [resolvable:$true] %s440_s16 }
  0x53   : > { %s2593_s1 = scalar_lea.vmem %s409_s22, 512  ;;  %p3384_p5 = pneg %p2924_p6 }
  0x54   : > { %p2594_p9 = scmp.ne.s32.totalorder %s409_s22, %s2593_s1  ;;  %p2601_p12 = scmp.lt.s32.totalorder %s409_s22, %s409_s22 }
  0x55   : > { %p2602_p10 = scmp.lt.s32.totalorder %s2593_s1, %s2593_s1 }
  0x56   : > { %p2596_p8 = pnand %p2594_p9, %p3384_p5 }
  0x57   : > { %p2603_p1 = por %p2602_p10, %p2601_p12 }
  0x58   : > { %p2597_p2 = pneg %p2596_p8 }
  0x5a   : > { %p2604_p7 = pnand %p2603_p1, %p2597_p2 }
  0x5c   : > { %2607 = shalt.err (!%p2604_p7)
}
  0x5d   : > { %s3385_s3 = smov 8   ;;  %s3386_s11 = smov 128  }
  0x5e   : > { %s3387_s5 = sld [smem:[#allocation34_spill]]  ;;  %s2619_s23 = scalar_lea.vmem %s441_s16, 512 }
  0x5f   : > { %p2620_p4 = scmp.ne.s32.totalorder %s441_s16, %s2619_s23  ;;  %p3388_p8 = pmov %p3384_p5 }
  0x60   : > { %p2627_p12 = scmp.lt.s32.totalorder %s441_s16, %s441_s16  ;;  %p2628_p2 = scmp.lt.s32.totalorder %s2619_s23, %s2619_s23 }
  0x61   : > { %p2622_p13 = pnand %p2620_p4, %p3388_p8 }
  0x62   : > { %p2629_p5 = por %p2628_p2, %p2627_p12 }
  0x63   : > { %p2623_p9 = pneg %p2622_p13 }
  0x64   : > { %2374 = dma.hbm_to_vmem [thread:$0]  (!%p2924_p6), %s3387_s5, 512, %s409_s22, [#allocation13], %s3386_s11, %s3386_s11, %s3385_s3  }
  0x65   : > { %p2630_p10 = pnand %p2629_p5, %p2623_p9 }
  0x67   : > { %2633 = shalt.err (!%p2630_p10)
}
  0x68   : > { %2380 = dma.hbm_to_vmem [thread:$0]  (!%p2924_p6), %s3336_s9, 512, %s441_s16, [#allocation16], %s3386_s11, %s3386_s11, %s3385_s3  }
  0x69   : > { %s473_s17 = scalar_lea.hbm %s3327_s0, %s2989_s7  ;;  %s467_s29 = scalar_lea.vmem [#allocation6], %s2993_s20 }
  0x6a   : > { %s475_s30 = sshll.u32 %s467_s29, 4  ;;  %s511_s5 = scalar_lea.hbm %s3329_s2, %s2989_s7  ;;  %s476_s30 = int_to_ptr.vmem [resolvable:$true] %s475_s30 }
  0x6b   : > { %s3389_s21 = sand.u32 1, %s2770_s27   ;;  %s2647_s1 = scalar_lea.vmem %s476_s30, 128 }
  0x6c   : > { %s464_s28 = scalar_lea.sflag [#allocation7], %s3389_s21  ;;  %p2648_p1 = scmp.ne.s32.totalorder %s476_s30, %s2647_s1 }
  0x6d   : > { %p3390_p7 = pneg %p2997_p0  ;;  %s2791_s16 = smov [#allocation6]  }
  0x6e   : > { %s2652_s3 = sshll.u32 %s2791_s16, 4  ;;  %s2653_s3 = int_to_ptr.vmem [resolvable:$false] %s2652_s3 }
  0x6f   : > { %p2650_p4 = pnand %p2648_p1, %p3390_p7  ;;  %s2654_s11 = scalar_lea.vmem %s2653_s3, 256 }
  0x70   : > { %p2655_p6 = scmp.lt.s32.totalorder %s476_s30, %s2653_s3  ;;  %p2656_p13 = scmp.lt.s32.totalorder %s2654_s11, %s2647_s1 }
  0x71   : > { %p2651_p8 = pneg %p2650_p4 }
  0x72   : > { %p2657_p9 = por %p2656_p13, %p2655_p6 }
  0x74   : > { %p2658_p12 = pnand %p2657_p9, %p2651_p8 }
  0x76   : > { %2661 = shalt.err (!%p2658_p12)
}
  0x77   : > { %2384 = dma.hbm_to_vmem [thread:$0]  (!%p2997_p0), %s473_s17, 128, %s476_s30, %s464_s28  }
  0x78   : > { %s505_s21 = scalar_lea.vmem [#allocation11], %s2993_s20  ;;  %p3391_p5 = pmov %p3390_p7 }
  0x79   : > { %s513_s13 = sshll.u32 %s505_s21, 4  ;;  %s2792_s22 = smov [#allocation11]   ;;  %s514_s13 = int_to_ptr.vmem [resolvable:$true] %s513_s13 }
  0x7a   : > { %s2675_s25 = scalar_lea.vmem %s514_s13, 128  ;;  %s2680_s29 = sshll.u32 %s2792_s22, 4  ;;  %s2681_s29 = int_to_ptr.vmem [resolvable:$false] %s2680_s29 }
  0x7b   : > { %p2676_p2 = scmp.ne.s32.totalorder %s514_s13, %s2675_s25  ;;  %s2682_s18 = scalar_lea.vmem %s2681_s29, 256 }
  0x7c   : > { %p2683_p7 = scmp.lt.s32.totalorder %s514_s13, %s2681_s29  ;;  %p2684_p4 = scmp.lt.s32.totalorder %s2682_s18, %s2675_s25 }
  0x7d   : > { %p2678_p10 = pnand %p2676_p2, %p3391_p5 }
  0x7e   : > { %p2685_p8 = por %p2684_p4, %p2683_p7 }
  0x7f   : > { %p2679_p1 = pneg %p2678_p10 }
  0x81   : > { %p2686_p6 = pnand %p2685_p8, %p2679_p1 }
  0x83   : > { %2689 = shalt.err (!%p2686_p6)
}
  0x84   : > { %2390 = dma.hbm_to_vmem [thread:$0]  (!%p2997_p0), %s511_s5, 128, %s514_s13, %s3007_s12  }
  0x85   : > { %522 = sbr.rel (%p2915_p3) target bundleno = 2442 (0x98a), region = 72  ;;  %s3070_s17 = sand.u32 (!%p2915_p3), 1, %s2766_s26  }
  0x86   : > { %s3073_s30 = sshll.u32 (!%p2915_p3), %s3070_s17, 3  ;;  %s525_s24 = scalar_lea.sflag (!%p2915_p3), [#allocation7], %s3070_s17 }
  0x87   : > { %s528_s23 = scalar_lea.vmem (!%p2915_p3), [#allocation6], %s3073_s30 }
  0x8a   : > { %2741 = dma.done.wait (%p2971_p11), %s525_s24, 128  }
  0x8b   : > { %2743 = vsyncadd (%p2971_p11), %s525_s24, 4294967168  ;;  %s533_s5 = sand.u32 1, %s2910_s14   ;;  %s537_s12 = scalar_lea.vmem [#allocation9], %s3073_s30 }
  0x8c   : > { %s534_s7 = scalar_lea.sflag [#allocation10], %s533_s5 }
  0x8d   : > { %2745 = dma.done.wait (%p2971_p11), %s534_s7, 256  }
  0x8e   : > { %2747 = vsyncadd (%p2971_p11), %s534_s7, 4294967040  ;;  %s546_s15 = scalar_lea.vmem [#allocation11], %s3073_s30  ;;  %p3392_p3 = scmp.eq.s32.totalorder %s2910_s14, 0 }
  0x90   : > { %2749 = dma.done.wait (%p3392_p3), [#allocation13], 1024   ;;  %p3393_p0 = pmov %p3392_p3 }
  0x92   : > { %2751 = vsyncadd (%p3393_p0), [#allocation13], 4294966272  ;;  %p3394_p13 = pmov %p3393_p0 }
  0x93   : > { %p3395_p9 = pmov %p3393_p0 }
  0x94   : > { %2753 = dma.done.wait (%p3394_p13), [#allocation16], 1024  }
  0x95   : > { %2755 = vsyncadd (%p3395_p9), [#allocation16], 4294966272  ;;  %vm631_vm0 = vcmask 261120   ;;  %v2793_v0 = vmov 0.0   ;;  %vm2794_vm1 = vmmov 0   ;;  %v623_v1 = vld [vmem:[#allocation12 + $0x18] sm:$0xff] }
  0x96   : > { %2260 = vmatprep.subr.mxu0 %v2793_v0  ;;  %2271 = vmatprep.subr.mxu1 %v2793_v0  ;;  %709 = vst.msk [vmem:[#allocation5] sm:$0xff] %vm631_vm0, %v2793_v0  ;;  %v622_v2 = vld [vmem:[#allocation12 + $0x10] sm:$0xff]  ;;  %v714_v3 = vld [vmem:[#allocation14 + $0x18] sm:$0xff]  ;;  %v621_v5 = vld [vmem:[#allocation12 + $0x8] sm:$0xff]  ;;  %vm882_vm2 = vcmask 64512   ;;  %s2795_s3 = smov 120  }
  0x97   : > { %2268 = vmatprep.mubr.msk.f32.mxu0 %vm2794_vm1, %v2793_v0  ;;  %2279 = vmatprep.mubr.msk.f32.mxu1 %vm2794_vm1, %v2793_v0  ;;  %v713_v4 = vld [vmem:[#allocation14 + $0x10] sm:$0xff]  ;;  %v712_v6 = vld [vmem:[#allocation14 + $0x8] sm:$0xff]  ;;  %v620_v7 = vld [vmem:[#allocation12] sm:$0xff]  ;;  %s2796_s11 = smov 112   ;;  %s2797_s21 = smov 104   ;;  %vm706_vm3 = vcmask 31744  }
  0x98   : > { %2261 = vmatpush3.msra.mxu0 %v623_v1  ;;  %2272 = vmatpush3.msra.mxu1 %v714_v3  ;;  %v711_v8 = vld [vmem:[#allocation14] sm:$0xff]  ;;  %v619_v9 = vld [vmem:[%s528_s23] sm:$0xff]  ;;  %v798_v13 = vld [vmem:[#allocation15 + $0x8] sm:$0xff]  ;;  %v2798_v38 = vmov -inf   ;;  %708 = vst.msk [vmem:[#allocation4] sm:$0xff] %vm706_vm3, %v2793_v0  ;;  %v2799_v39 = vmov 0  }
  0x99   : > { %2262 = vmatprep.subr.mxu0 %v2793_v0  ;;  %2273 = vmatprep.subr.mxu1 %v2793_v0  ;;  %v710_v10 = vld [vmem:[%s537_s12] sm:$0xff]  ;;  %v800_v11 = vld [vmem:[#allocation15 + $0x18] sm:$0xff]  ;;  %v799_v12 = vld [vmem:[#allocation15 + $0x10] sm:$0xff]  ;;  %707 = vst.msk [vmem:[#allocation3] sm:$0xff] %vm706_vm3, %v2798_v38  ;;  %vm981_vm4 = vcmask 7168   ;;  %v2800_v59 = vmov 1  }
  0x9a   : > { %2263 = vmatpush3.msra.mxu0 %v622_v2  ;;  %2274 = vmatpush3.msra.mxu1 %v713_v4  ;;  %v797_v14 = vld [vmem:[#allocation15] sm:$0xff]  ;;  %v2198_v15 = vld [vmem:[%s3331_s4] ss:$0 sm:$0xff]  ;;  %v2801_v60 = vmov 2   ;;  %vm1166_vm5 = vcmask 15368   ;;  %v2802_v3 = vmov 3  }
  0x9b   : > { %2264 = vmatprep.subr.mxu0 %v2793_v0  ;;  %2275 = vmatprep.subr.mxu1 %v2793_v0  ;;  %v2200_v16 = vld [vmem:[%s3333_s6] ss:$0 sm:$0xff]  ;;  %vm1360_vm6 = vcmask 23568   ;;  %vm1553_vm7 = vcmask 31768   ;;  %s2803_s22 = smov 8   ;;  %s2804_s29 = smov 16  }
  0x9c   : > { %2265 = vmatpush3.msra.mxu0 %v621_v5  ;;  %2276 = vmatpush3.msra.mxu1 %v712_v6  ;;  %v796_v21 = vld [vmem:[%s546_s15] sm:$0xff]  ;;  %s2805_s18 = smov 24   ;;  %vm1257_vm8 = vcmask 130112   ;;  %vm1450_vm9 = vcmask 195712   ;;  %vm1643_vm10 = vcmask 261312   ;;  %vm1875_vm11 = vcmask 130048  }
  0x9d   : > { %2266 = vmatprep.subr.mxu0 %v2793_v0  ;;  %2277 = vmatprep.subr.mxu1 %v2793_v0  ;;  %v2202_v31 = vld [vmem:[%s3335_s8] ss:$0 sm:$0xff]  ;;  %vm1877_vm12 = vcmask 195584   ;;  %s3396_s24 = sld [smem:[#allocation25_spill]]  ;;  %s614_s16 = scalar_lea.vmem [#allocation18], %s3073_s30 }
  0x9e   : > { %2267 = vmatpush3.msra.mxu0 %v620_v7  ;;  %2278 = vmatpush3.msra.mxu1 %v711_v8  ;;  %s3397_s23 = sld [smem:[#allocation29_spill]] }
  0x9f   : > { %2269 = vmatmul.mubr.msk.f32.vlgmr.msra.gmra.mxu0 %vm631_vm0, %v619_v9  ;;  %2280 = vmatmul.mubr.msk.f32.vlgmr.msra.gmra.mxu1 %vm631_vm0, %v710_v10  ;;  %v975_v38 = vld [vmem:[#allocation4] sm:$0xff]  ;;  %s3398_s12 = sld [smem:[#allocation36_spill]] }
  0xa0   : > { %2293 = vmatprep.subr.mxu1 %v2793_v0  ;;  %2295 = vmatprep.mubr.msk.f32.mxu1 %vm2794_vm1, %v2793_v0  ;;  %v959_v44 = vld [vmem:[#allocation3] sm:$0xff]  ;;  %s3399_s19 = sld [smem:[#allocation37_spill]] }
  0xa1   : > { %2282 = vmatprep.subr.mxu0 %v2793_v0  ;;  %2290 = vmatprep.mubr.msk.f32.mxu0 %vm2794_vm1, %v2793_v0  ;;  %s3400_s13 = sld [smem:[#allocation38_spill]] }
  0xa2   : > { %2283 = vmatpush3.msra.mxu0 %v800_v11  ;;  %2474 = vset.pattern.permute.xlu0 %v2799_v39 }
  0xa3   : > { %2284 = vmatprep.subr.mxu0 %v2793_v0  ;;  %2475 = vset.pattern.permute.xlu1 %v2800_v59  ;;  %s2221_s1 = sshll.u32 %s3396_s24, 7 }
  0xa4   : > { %2285 = vmatpush3.msra.mxu0 %v799_v12  ;;  %p3401_p12 = scmp.ne.s32.totalorder %s3397_s23, 0 }
  0xa5   : > { %2286 = vmatprep.subr.mxu0 %v2793_v0 }
  0xa6   : > { %2287 = vmatpush3.msra.mxu0 %v798_v13 }
  0xa7   : > { %2288 = vmatprep.subr.mxu0 %v2793_v0  ;;  %s2007_s25 = scalar_lea.hbm %s3400_s13, %s2221_s1 }
  0xa8   : > { %2289 = vmatpush3.msra.mxu0 %v797_v14 }
  0xa9   : > { %2313 = vmatprep.subr.mxu0 %v2793_v0  ;;  %2291 = vmatmul.mubr.msk.f32.vlgmr.msra.gmra.mxu0 %vm631_vm0, %v796_v21 }
  0xaa   : > { %2315 = vmatprep.mubr.msk.f32.mxu0 %vm2794_vm1, %v2793_v0 }
 0x15f   : > { %v701_v17 = vpop.f32.mrf.mxu0  ;;  %v792_v18 = vpop.f32.mrf.mxu1 }
 0x160   : > { %v702_v19 = vadd.f32 %v2198_v15, %v701_v17  ;;  %v793_v20 = vadd.f32 %v2200_v16, %v792_v18 }
 0x161   : > { %v2270_v22 = vpop.f32.mrf.mxu0  ;;  %v2281_v23 = vpop.f32.mrf.mxu1 }
 0x162   : > { %705 = vst.msk [vmem:[#allocation2] sm:$0xff] %vm631_vm0, %v702_v19  ;;  %1068 = vrot.lane.b32.xlu1 %v793_v20, %s2795_s3  ;;  %2294 = vmatpush3.xpose.msk.msra.mxu1 %vm882_vm2, %v793_v20  ;;  %v983_v23 = vld [vmem:[#allocation5] sm:$0xff] }
 0x163   : > { %2298 = vmatprep.subr.mxu1 %v2793_v0 }
 0x169   : > { %v881_v24 = vld [vmem:[#allocation2] sm:$0xff]  ;;  %v877_v32 = vpop.f32.mrf.mxu0 }
 0x16a   : > { %1066 = vrot.lane.b32.xlu1 %v881_v24, %s2795_s3  ;;  %2296 = vmatmul.mubr.msk.f32.vlgmr.msra.gmra.mxu1 %vm882_vm2, %v881_v24  ;;  %v3162_v33 = vadd.f32 %v2202_v31, %v877_v32 }
 0x16b   : > { %2300 = vmatprep.mubr.msk.f32.mxu1 %vm2794_vm1, %v2793_v0  ;;  %v2292_v34 = vpop.f32.mrf.mxu0 }
 0x16c   : > { %2299 = vmatpush3.msra.mxu1 %v3162_v33 }
 0x16d   : > { %2303 = vmatprep.subr.mxu1 %v2793_v0 }
 0x16e   : > { %1262 = vrot.lane.b32.xlu1 %v793_v20, %s2796_s11 }
 0x172   : > { %1260 = vrot.lane.b32.xlu1 %v881_v24, %s2796_s11 }
 0x176   : > { %1455 = vrot.lane.b32.xlu1 %v793_v20, %s2797_s21 }
 0x17a   : > { %1453 = vrot.lane.b32.xlu1 %v881_v24, %s2797_s21 }
 0x1d4   : > { %v1069_v25 = vpop.permute.xlu1 %1068 }
 0x1dc   : > { %v1067_v26 = vpop.permute.xlu1 %1066 }
 0x1e0   : > { %v1263_v27 = vpop.permute.xlu1 %1262 }
 0x1e1   : > { %2314 = vmatpush3.xpose.msk.msra.mxu0 %vm882_vm2, %v1263_v27 }
 0x1e2   : > { %2323 = vmatprep.subr.mxu0 %v2793_v0 }
 0x1e4   : > { %v1261_v28 = vpop.permute.xlu1 %1260 }
 0x1e5   : > { %2316 = vmatmul.mubr.msk.f32.vlgmr.msra.gmra.mxu0 %vm882_vm2, %v1261_v28 }
 0x1e6   : > { %2325 = vmatprep.mubr.msk.f32.mxu0 %vm2794_vm1, %v2793_v0 }
 0x1e8   : > { %v1456_v29 = vpop.permute.xlu1 %1455 }
 0x1e9   : > { %2324 = vmatpush3.xpose.msk.msra.mxu0 %vm882_vm2, %v1456_v29 }
 0x1ea   : > { %2333 = vmatprep.subr.mxu0 %v2793_v0 }
 0x1ec   : > { %v1454_v30 = vpop.permute.xlu1 %1453 }
 0x1ed   : > { %2326 = vmatmul.mubr.msk.f32.vlgmr.msra.gmra.mxu0 %vm882_vm2, %v1454_v30 }
 0x1ee   : > { %2341 = vmatprep.mubr.msk.f32.mxu0 %vm2794_vm1, %v2793_v0 }
 0x22a   : > { %v955_v35 = vpop.f32.mrf.mxu1 }
 0x22b   : > { %v960_v36 = vsel %vm882_vm2, %v955_v35, -inf }
 0x22c   : > { %961 = vmax.xlane.f32.xlu0 %v960_v36  ;;  %v2297_v37 = vpop.f32.mrf.mxu1 }
 0x2a5   : > { %v3168_v40 = vpop.f32.mrf.mxu0 }
 0x2a6   : > { %v1339_v48 = vsel %vm882_vm2, %v3168_v40, -inf }
 0x2a7   : > { %v2317_v41 = vpop.f32.mrf.mxu0 }
 0x2ad   : > { %v3170_v42 = vpop.f32.mrf.mxu0 }
 0x2ae   : > { %v1532_v58 = vsel %vm882_vm2, %v3170_v42, -inf }
 0x2af   : > { %v2327_v43 = vpop.f32.mrf.mxu0 }
 0x2b5   : > { %v962_v45 = vpop.xlane.xlu0 %961 }
 0x2b6   : > { %v963_v46 = vmax.f32 %v959_v44, %v962_v45 }
 0x2b8   : > { %v964_v47 = vsub.f32 %v959_v44, %v963_v46  ;;  %1065 = vst.msk [vmem:[#allocation3] sm:$0xff] %vm981_vm4, %v963_v46  ;;  %969 = vperm.xlu0 %2474, %v963_v46  }
 0x2ba   : > { %v965_v61 = vmul.f32 1.442695, %v964_v47 }
 0x2bc   : > { %2476 = vset.pattern.permute.xlu0 %v2801_v60 }
 0x2bf   : > { %v1144_v62 = vld [vmem:[#allocation3] sm:$0xff] }
 0x2d7   : > { %1340 = vmax.xlane.f32.xlu0 %v1339_v48 }
 0x333   : > { %v970_v49 = vpop.permute.xlu0 %969 }
 0x334   : > { %v972_v50 = vsub.f32 %v955_v35, %v970_v49 }
 0x336   : > { %v973_v51 = vmul.f32 1.442695, %v972_v50 }
 0x338   : > { %2482 = vpow2.f32 %v973_v51 }
 0x339   : > { %2484 = vpow2.f32 %v965_v61  ;;  %v1667_v61 = vlaneseq }
 0x345   : > { %v2483_v52 = vpop.eup %2482 }
 0x346   : > { %2301 = vmatmul.mubr.msk.f32.vlgmr.msra.gmra.mxu1 %vm882_vm2, %v2483_v52  ;;  %v2485_v8 = vpop.eup %2484  ;;  %v977_v14 = vsel %vm882_vm2, %v2483_v52, 0.0 }
 0x347   : > { %2304 = vmatpush3.xpose.msk.msra.mxu1 %vm882_vm2, %v1069_v25  ;;  %2305 = vmatprep.mubr.msk.f32.mxu1 %vm2794_vm1, %v2793_v0 }
 0x348   : > { %2308 = vmatprep.subr.mxu1 %v2793_v0 }
 0x34a   : > { %2306 = vmatmul.mubr.msk.f32.vlgmr.msra.gmra.mxu1 %vm882_vm2, %v1067_v26 }
 0x34b   : > { %2310 = vmatprep.mubr.msk.f32.mxu1 %vm2794_vm1, %v2793_v0 }
 0x360   : > { %v1341_v4 = vpop.xlane.xlu0 %1340 }
 0x406   : > { %v3183_v53 = vpop.f32.mrf.mxu1 }
 0x408   : > { %v2302_v54 = vpop.f32.mrf.mxu1 }
 0x40a   : > { %v1140_v55 = vpop.f32.mrf.mxu1 }
 0x40b   : > { %v1145_v56 = vsel %vm882_vm2, %v1140_v55, -inf }
 0x40c   : > { %1146 = vmax.xlane.f32.xlu1 %v1145_v56  ;;  %v2307_v57 = vpop.f32.mrf.mxu1 }
 0x410   : > { %1533 = vmax.xlane.f32.xlu1 %v1532_v58 }
 0x495   : > { %v1147_v63 = vpop.xlane.xlu1 %1146 }
 0x496   : > { %v1148_v1 = vmax.f32 %v1144_v62, %v1147_v63  ;;  %v3244_v63 = vshrl.u32 %v1667_v61, 7 }
 0x498   : > { %v1149_v2 = vsub.f32 %v1144_v62, %v1148_v1  ;;  %1259 = vst.msk [vmem:[#allocation3] sm:$0xff] %vm1166_vm5, %v1148_v1  ;;  %1154 = vperm.xlu1 %2475, %v1148_v1   ;;  %v1732_v1 = vsub.s32 0, %v3244_v63 }
 0x499   : > { %v1534_v10 = vpop.xlane.xlu1 %1533 }
 0x49a   : > { %v1150_v13 = vmul.f32 1.442695, %v1149_v2 }
 0x49c   : > { %1176 = vrot.lane.b32.xlu1 %v3162_v33, %s2795_s3  ;;  %2486 = vpow2.f32 %v1150_v13 }
 0x49d   : > { %2477 = vset.pattern.permute.xlu1 %v2802_v3 }
 0x49f   : > { %v3192_v5 = vld [vmem:[#allocation3] sm:$0xff] }
 0x4a0   : > { %v3195_v6 = vmax.f32 %v3192_v5, %v1341_v4 }
 0x4a2   : > { %1452 = vst.msk [vmem:[#allocation3] sm:$0xff] %vm1360_vm6, %v3195_v6  ;;  %1348 = vperm.xlu0 %2476, %v3195_v6   ;;  %v1343_v7 = vsub.f32 %v3192_v5, %v3195_v6 }
 0x4a6   : > { %2478 = vset.pattern.permute.xlu0 %v2799_v39  ;;  %v976_v39 = vmul.f32 %v2485_v8, %v975_v38  ;;  %v2806_v38 = vmov 1983009808  }
 0x4a7   : > { %986 = vperm.xlu0 %2478, %v2485_v8  }
 0x4a9   : > { %v3202_v9 = vld [vmem:[#allocation3] sm:$0xff]  ;;  %v2487_v15 = vpop.eup %2486 }
 0x4aa   : > { %v3205_v11 = vmax.f32 %v3202_v9, %v1534_v10 }
 0x4ab   : > { %2480 = vset.pattern.permute.xlu0 %v2801_v60 }
 0x4ac   : > { %v1536_v12 = vsub.f32 %v3202_v9, %v3205_v11  ;;  %1645 = vst.msk [vmem:[#allocation3] sm:$0xff] %vm1553_vm7, %v3205_v11  ;;  %1541 = vperm.xlu1 %2477, %v3205_v11  }
 0x4ae   : > { %v1537_v47 = vmul.f32 1.442695, %v1536_v12 }
 0x4b0   : > { %1369 = vrot.lane.b32.xlu1 %v3162_v33, %s2796_s11 }
 0x4b1   : > { %2479 = vset.pattern.permute.xlu1 %v2800_v59 }
 0x4b4   : > { %1562 = vrot.lane.b32.xlu1 %v3162_v33, %s2797_s21 }
 0x4d8   : > { %978 = vadd.xlane.f32.xlu1 %v977_v14 }
 0x4e9   : > { %1171 = vperm.xlu1 %2479, %v2487_v15  }
 0x513   : > { %v1155_v16 = vpop.permute.xlu1 %1154 }
 0x514   : > { %v1157_v17 = vsub.f32 %v1140_v55, %v1155_v16 }
 0x516   : > { %v1158_v18 = vmul.f32 1.442695, %v1157_v17 }
 0x517   : > { %v1177_v19 = vpop.permute.xlu1 %1176 }
 0x518   : > { %2488 = vpow2.f32 %v1158_v18  ;;  %2309 = vmatpush3.msra.mxu1 %v1177_v19 }
 0x519   : > { %2318 = vmatprep.subr.mxu1 %v2793_v0 }
 0x51d   : > { %v1349_v20 = vpop.permute.xlu0 %1348 }
 0x51e   : > { %v1351_v21 = vsub.f32 %v3168_v40, %v1349_v20 }
 0x520   : > { %v1352_v22 = vmul.f32 1.442695, %v1351_v21 }
 0x522   : > { %2490 = vpow2.f32 %v1352_v22  ;;  %v987_v24 = vpop.permute.xlu0 %986 }
 0x523   : > { %v989_v25 = vmul.f32 %v987_v24, %v983_v23  ;;  %v1746_v24 = vsub.s32 2, %v3244_v63 }
 0x525   : > { %v2489_v26 = vpop.eup %2488  ;;  %v1063_v27 = vadd.f32 %v3183_v53, %v989_v25 }
 0x526   : > { %2311 = vmatmul.mubr.msk.f32.vlgmr.msra.gmra.mxu1 %vm882_vm2, %v2489_v26  ;;  %v1162_v28 = vsel %vm882_vm2, %v2489_v26, 0.0 }
 0x527   : > { %1064 = vst.msk [vmem:[#allocation5] sm:$0xff] %vm882_vm2, %v1063_v27  ;;  %1163 = vadd.xlane.f32.xlu0 %v1162_v28  ;;  %v1542_v29 = vpop.permute.xlu1 %1541  ;;  %2320 = vmatprep.mubr.msk.f32.mxu1 %vm2794_vm1, %v2793_v0  ;;  %v1760_v27 = vsub.s32 4, %v3244_v63  ;;  %v1753_v28 = vsub.s32 3, %v3244_v63 }
 0x528   : > { %v1544_v30 = vsub.f32 %v3170_v42, %v1542_v29  ;;  %v1344_v42 = vmul.f32 1.442695, %v1343_v7  ;;  %v1739_v7 = vsub.s32 1, %v3244_v63 }
 0x52a   : > { %v1545_v31 = vmul.f32 1.442695, %v1544_v30 }
 0x52b   : > { %v1370_v32 = vpop.permute.xlu1 %1369 }
 0x52c   : > { %2492 = vpow2.f32 %v1545_v31  ;;  %2319 = vmatpush3.msra.mxu1 %v1370_v32  ;;  %v1774_v31 = vsub.s32 6, %v3244_v63  ;;  %v1767_v32 = vsub.s32 5, %v3244_v63 }
 0x52d   : > { %2328 = vmatprep.subr.mxu1 %v2793_v0  ;;  %2494 = vpow2.f32 %v1344_v42  ;;  %v2807_v42 = vmov 1934713408  }
 0x52e   : > { %2496 = vpow2.f32 %v1537_v47 }
 0x52f   : > { %v2491_v33 = vpop.eup %2490  ;;  %v1563_v34 = vpop.permute.xlu1 %1562 }
 0x530   : > { %2321 = vmatmul.mubr.msk.f32.vlgmr.msra.gmra.mxu1 %vm882_vm2, %v2491_v33  ;;  %v1356_v35 = vsel %vm882_vm2, %v2491_v33, 0.0 }
 0x531   : > { %2329 = vmatpush3.msra.mxu1 %v1563_v34  ;;  %1357 = vadd.xlane.f32.xlu1 %v1356_v35  ;;  %v1781_v35 = vsub.s32 7, %v3244_v63 }
 0x532   : > { %2330 = vmatprep.mubr.msk.f32.mxu1 %vm2794_vm1, %v2793_v0 }
 0x539   : > { %v2493_v36 = vpop.eup %2492 }
 0x53a   : > { %2331 = vmatmul.mubr.msk.f32.vlgmr.msra.gmra.mxu1 %vm882_vm2, %v2493_v36  ;;  %v1549_v37 = vsel %vm882_vm2, %v2493_v36, 0.0  ;;  %v2495_v49 = vpop.eup %2494 }
 0x53b   : > { %1550 = vadd.xlane.f32.xlu1 %v1549_v37  ;;  %v2497_v54 = vpop.eup %2496  ;;  %v1882_v37 = vld [vmem:[#allocation17 + $0x18] sm:$0xff] }
 0x53c   : > { %2334 = vmatpush3.msra.mxu0 %v1882_v37 }
 0x53d   : > { %2335 = vmatprep.subr.mxu0 %v2793_v0 }
 0x561   : > { %v979_v40 = vpop.xlane.xlu1 %978 }
 0x562   : > { %v980_v41 = vadd.f32 %v979_v40, %v976_v39  ;;  %v1665_v39 = vunpack.c.l.s4 %v2806_v38 }
 0x564   : > { %982 = vst.msk [vmem:[#allocation4] sm:$0xff] %vm981_vm4, %v980_v41 }
 0x565   : > { %v1172_v48 = vpop.permute.xlu1 %1171 }
 0x56b   : > { %v1160_v43 = vld [vmem:[#allocation4] sm:$0xff] }
 0x56c   : > { %v1161_v44 = vmul.f32 %v2487_v15, %v1160_v43  ;;  %v1697_v43 = vunpack.c.l.s4 %v2807_v42 }
 0x56e   : > { %v1698_v47 = vunpack.c.0.s8 %v1697_v43 }
 0x5b0   : > { %v1164_v45 = vpop.xlane.xlu0 %1163 }
 0x5b1   : > { %v1165_v46 = vadd.f32 %v1164_v45, %v1161_v44  ;;  %v1666_v44 = vunpack.c.0.s8 %v1665_v39 }
 0x5b3   : > { %1167 = vst.msk [vmem:[#allocation4] sm:$0xff] %vm1166_vm5, %v1165_v46 }
 0x5ba   : > { %v1354_v50 = vld [vmem:[#allocation4] sm:$0xff]  ;;  %v1358_v52 = vpop.xlane.xlu1 %1357 }
 0x5bb   : > { %v1355_v51 = vmul.f32 %v2495_v49, %v1354_v50 }
 0x5bd   : > { %v1359_v53 = vadd.f32 %v1358_v52, %v1355_v51 }
 0x5bf   : > { %1361 = vst.msk [vmem:[#allocation4] sm:$0xff] %vm1360_vm6, %v1359_v53 }
 0x5c4   : > { %v1551_v57 = vpop.xlane.xlu1 %1550 }
 0x5c6   : > { %v1547_v55 = vld [vmem:[#allocation4] sm:$0xff] }
 0x5c7   : > { %v1548_v56 = vmul.f32 %v2497_v54, %v1547_v55  ;;  %v1701_v55 = vsub.s32 %v1698_v47, %v3244_v63 }
 0x5c9   : > { %v1552_v58 = vadd.f32 %v1551_v57, %v1548_v56 }
 0x5cb   : > { %1554 = vst.msk [vmem:[#allocation4] sm:$0xff] %vm1553_vm7, %v1552_v58 }
 0x5d2   : > { %v1649_v59 = vld [vmem:[#allocation4] sm:$0xff] }
 0x5d3   : > { %2498 = vrcp.f32 %v1649_v59 }
 0x5e0   : > { %v2499_v2 = vpop.eup %2498 }
 0x5e1   : > { %v1733_v6 = vrot.slane %v2499_v2, %v1732_v1  ;;  %v1740_v10 = vrot.slane %v2499_v2, %v1739_v7  ;;  %v1747_v26 = vrot.slane %v2499_v2, %v1746_v24  ;;  %v1761_v29 = vrot.slane %v2499_v2, %v1760_v27 }
 0x5e2   : > { %v1754_v30 = vrot.slane %v2499_v2, %v1753_v28  ;;  %v1775_v33 = vrot.slane %v2499_v2, %v1774_v31  ;;  %v1768_v34 = vrot.slane %v2499_v2, %v1767_v32  ;;  %v1782_v36 = vrot.slane %v2499_v2, %v1781_v35 }
 0x5e6   : > { %v1248_v60 = vpop.f32.mrf.mxu1 }
 0x5e7   : > { %1253 = vrot.lane.b32.xlu0 %v1248_v60, %s2803_s22 }
 0x5e8   : > { %v2312_v62 = vpop.f32.mrf.mxu1 }
 0x5eb   : > { %1365 = vperm.xlu0 %2480, %v2495_v49  }
 0x5ef   : > { %2481 = vset.pattern.permute.xlu0 %v2802_v3  ;;  %v1168_v3 = vld [vmem:[#allocation5] sm:$0xff] }
 0x5f0   : > { %1558 = vperm.xlu0 %2481, %v2497_v54   ;;  %v1441_v4 = vpop.f32.mrf.mxu1  ;;  %v1174_v11 = vmul.f32 %v1172_v48, %v1168_v3  ;;  %v1669_v48 = vsub.s32 %v1666_v44, %v3244_v63 }
 0x5f1   : > { %1446 = vrot.lane.b32.xlu1 %v1441_v4, %s2804_s29 }
 0x5f2   : > { %v2322_v5 = vpop.f32.mrf.mxu1 }
 0x5f5   : > { %1735 = vbcast.lane.b32.xlu1 %v1733_v6, 256 }
 0x5fa   : > { %v1634_v8 = vpop.f32.mrf.mxu1 }
 0x5fb   : > { %1639 = vrot.lane.b32.xlu0 %v1634_v8, %s2805_s18 }
 0x5fc   : > { %v2332_v9 = vpop.f32.mrf.mxu1 }
 0x5ff   : > { %1742 = vbcast.lane.b32.xlu0 %v1740_v10, 256 }
 0x659   : > { %v1254_v12 = vpop.permute.xlu0 %1253 }
 0x65a   : > { %v1256_v13 = vadd.f32 %v1254_v12, %v1174_v11 }
 0x65c   : > { %1258 = vst.msk [vmem:[#allocation5] sm:$0xff] %vm1257_vm8, %v1256_v13 }
 0x663   : > { %v1362_v15 = vld [vmem:[#allocation5] sm:$0xff]  ;;  %v1447_v17 = vpop.permute.xlu1 %1446 }
 0x666   : > { %v1366_v14 = vpop.permute.xlu0 %1365 }
 0x667   : > { %v1368_v16 = vmul.f32 %v1366_v14, %v1362_v15  ;;  %v1736_v40 = vpop.permute.xlu1 %1735 }
 0x669   : > { %v1449_v18 = vadd.f32 %v1447_v17, %v1368_v16 }
 0x66b   : > { %1451 = vst.msk [vmem:[#allocation5] sm:$0xff] %vm1450_vm9, %v1449_v18  ;;  %v1559_v19 = vpop.permute.xlu0 %1558 }
 0x66f   : > { %v1640_v22 = vpop.permute.xlu0 %1639 }
 0x672   : > { %v1555_v20 = vld [vmem:[#allocation5] sm:$0xff] }
 0x673   : > { %v1561_v21 = vmul.f32 %v1559_v19, %v1555_v20  ;;  %v1743_v41 = vpop.permute.xlu0 %1742 }
 0x675   : > { %v1642_v23 = vadd.f32 %v1640_v22, %v1561_v21  ;;  %v1881_v21 = vld [vmem:[#allocation17 + $0x10] sm:$0xff]  ;;  %v1880_v22 = vld [vmem:[#allocation17 + $0x8] sm:$0xff] }
 0x676   : > { %2336 = vmatpush3.msra.mxu0 %v1881_v21 }
 0x677   : > { %1644 = vst.msk [vmem:[#allocation5] sm:$0xff] %vm1643_vm10, %v1642_v23  ;;  %2337 = vmatprep.subr.mxu0 %v2793_v0 }
 0x678   : > { %2338 = vmatpush3.msra.mxu0 %v1880_v22 }
 0x679   : > { %2339 = vmatprep.subr.mxu0 %v2793_v0 }
 0x67e   : > { %v1651_v25 = vld [vmem:[#allocation5] sm:$0xff] }
 0x67f   : > { %1656 = vrot.lane.b32.xlu1 %v1651_v25, %s2796_s11  ;;  %1653 = vrot.lane.b32.xlu0 %v1651_v25, %s2795_s3  ;;  %s2009_s3 = sshll.u32 %s614_s16, 4  ;;  %s2010_s3 = int_to_ptr.vmem [resolvable:$true] %s2009_s3 }
 0x683   : > { %1749 = vbcast.lane.b32.xlu1 %v1747_v26, 256  ;;  %1659 = vrot.lane.b32.xlu0 %v1651_v25, %s2797_s21 }
 0x687   : > { %1763 = vbcast.lane.b32.xlu1 %v1761_v29, 256  ;;  %1756 = vbcast.lane.b32.xlu0 %v1754_v30, 256  ;;  %v1879_v30 = vld [vmem:[#allocation17] sm:$0xff] }
 0x688   : > { %2340 = vmatpush3.msra.mxu0 %v1879_v30 }
 0x68b   : > { %1777 = vbcast.lane.b32.xlu1 %v1775_v33, 256  ;;  %1770 = vbcast.lane.b32.xlu0 %v1768_v34, 256 }
 0x68f   : > { %1784 = vbcast.lane.b32.xlu0 %v1782_v36, 256 }
 0x6f1   : > { %v1654_v45 = vpop.permute.xlu0 %1653  ;;  %v1657_v46 = vpop.permute.xlu1 %1656 }
 0x6f2   : > { %v1662_v49 = vcombine.low %v1651_v25, %v1657_v46  ;;  %v1663_v50 = vcombine.high %v1651_v25, %v1657_v46 }
 0x6f4   : > { %v1670_v56 = vrot.slane %v1662_v49, %v1669_v48  ;;  %v1677_v57 = vrot.slane %v1663_v50, %v1669_v48  ;;  %v2216_v50 = vld [vmem:[%s3337_s10] ss:$0 sm:$0xff] }
 0x6f5   : > { %v1660_v51 = vpop.permute.xlu0 %1659  ;;  %v1750_v52 = vpop.permute.xlu1 %1749 }
 0x6f6   : > { %v1678_v53 = vcombine.low %v1654_v45, %v1660_v51  ;;  %v1679_v54 = vcombine.high %v1654_v45, %v1660_v51 }
 0x6f8   : > { %v1686_v58 = vrot.slane %v1678_v53, %v1669_v48  ;;  %v1693_v59 = vrot.slane %v1679_v54, %v1669_v48 }
 0x6f9   : > { %v1757_v60 = vpop.permute.xlu0 %1756  ;;  %v1764_v61 = vpop.permute.xlu1 %1763 }
 0x6fa   : > { %v1694_v62 = vcombine.low %v1670_v56, %v1686_v58  ;;  %v1695_v1 = vcombine.high %v1670_v56, %v1686_v58  ;;  %v1710_v2 = vcombine.low %v1677_v57, %v1693_v59  ;;  %v1711_v4 = vcombine.high %v1677_v57, %v1693_v59 }
 0x6fc   : > { %v1702_v5 = vrot.slane %v1694_v62, %v1701_v55  ;;  %v1709_v6 = vrot.slane %v1695_v1, %v1701_v55  ;;  %v1718_v7 = vrot.slane %v1710_v2, %v1701_v55  ;;  %v1725_v8 = vrot.slane %v1711_v4, %v1701_v55  ;;  %v2218_v2 = vld [vmem:[%s3398_s12] ss:$0 sm:$0xff] }
 0x6fd   : > { %v1771_v9 = vpop.permute.xlu0 %1770  ;;  %v1778_v10 = vpop.permute.xlu1 %1777 }
 0x6fe   : > { %v1786_v3 = vmul.f32 %v1736_v40, %v1702_v5  ;;  %v1788_v11 = vmul.f32 %v1750_v52, %v1709_v6  ;;  %v1726_v63 = vcombine.high %v1702_v5, %v2793_v0  ;;  %v1727_v12 = vcombine.high %v1709_v6, %v2793_v0  ;;  %v2219_v5 = vld [vmem:[%s3399_s19] ss:$0 sm:$0xff] }
 0x6ff   : > { %v1790_v13 = vmul.f32 %v1764_v61, %v1718_v7  ;;  %v1728_v14 = vcombine.high %v1718_v7, %v2793_v0  ;;  %v1792_v15 = vmul.f32 %v1778_v10, %v1725_v8  ;;  %v1729_v19 = vcombine.high %v1725_v8, %v2793_v0 }
 0x700   : > { %v1794_v16 = vcombine.low %v1786_v3, %v1788_v11  ;;  %v1787_v17 = vmul.f32 %v1743_v41, %v1726_v63  ;;  %v1789_v18 = vmul.f32 %v1757_v60, %v1727_v12 }
 0x701   : > { %v1785_v20 = vpop.permute.xlu0 %1784  ;;  %v1791_v24 = vmul.f32 %v1771_v9, %v1728_v14  ;;  %v1810_v25 = vcombine.low %v1790_v13, %v1792_v15 }
 0x702   : > { %v1802_v23 = vcombine.low %v1787_v17, %v1789_v18  ;;  %v1793_v26 = vmul.f32 %v1785_v20, %v1729_v19  ;;  %v1801_v27 = vrot.slane %v1794_v16, %v1669_v48 }
 0x703   : > { %v1817_v33 = vrot.slane %v1810_v25, %v1669_v48 }
 0x704   : > { %v1809_v28 = vrot.slane %v1802_v23, %v1669_v48  ;;  %v1818_v29 = vcombine.low %v1791_v24, %v1793_v26 }
 0x706   : > { %v1826_v31 = vcombine.low %v1801_v27, %v1809_v28  ;;  %v1827_v32 = vcombine.high %v1801_v27, %v1809_v28  ;;  %v1825_v34 = vrot.slane %v1818_v29, %v1669_v48 }
 0x708   : > { %v1842_v35 = vcombine.low %v1817_v33, %v1825_v34  ;;  %v1843_v36 = vcombine.high %v1817_v33, %v1825_v34  ;;  %v1841_v37 = vrot.slane %v1827_v32, %v1701_v55  ;;  %v1834_v39 = vrot.slane %v1826_v31, %v1701_v55 }
 0x70a   : > { %v1857_v38 = vrot.slane %v1843_v36, %v1701_v55  ;;  %v1850_v40 = vrot.slane %v1842_v35, %v1701_v55 }
 0x70c   : > { %v1860_v41 = vcombine.low %v1841_v37, %v1857_v38  ;;  %v1859_v42 = vcombine.high %v1834_v39, %v1850_v40  ;;  %v1858_v43 = vcombine.low %v1834_v39, %v1850_v40  ;;  %v1861_v0 = vcombine.high %v1841_v37, %v1857_v38 }
 0x70e   : > { %1867 = vrot.lane.b32.xlu0 %v1860_v41, %s2804_s29  ;;  %1863 = vrot.lane.b32.xlu1 %v1859_v42, %s2803_s22  ;;  %s1995_s22 = scalar_lea.sflag [#allocation8], %s3070_s17  ;;  %s2690_s29 = scalar_lea.vmem %s2010_s3, 128 }
 0x70f   : > { %p2691_p11 = scmp.ne.s32.totalorder %s2010_s3, %s2690_s29 }
 0x711   : > { %p2692_p2 = pnand %p2691_p11, %p3401_p12 }
 0x712   : > { %1871 = vrot.lane.b32.xlu1 %v1861_v0, %s2805_s18  ;;  %s2808_s18 = smov [#allocation18]  }
 0x713   : > { %p2693_p5 = pneg %p2692_p2  ;;  %s2694_s28 = sshll.u32 %s2808_s18, 4  ;;  %s2695_s28 = int_to_ptr.vmem [resolvable:$false] %s2694_s28 }
 0x714   : > { %s2696_s30 = scalar_lea.vmem %s2695_s28, 256  ;;  %p2697_p10 = scmp.lt.s32.totalorder %s2010_s3, %s2695_s28 }
 0x715   : > { %p2698_p1 = scmp.lt.s32.totalorder %s2696_s30, %s2690_s29 }
 0x717   : > { %p2699_p7 = por %p2698_p1, %p2697_p10 }
 0x719   : > { %p2700_p4 = pnand %p2699_p7, %p2693_p5 }
 0x780   : > { %v1864_v44 = vpop.permute.xlu1 %1863  ;;  %v1868_v45 = vpop.permute.xlu0 %1867 }
 0x781   : > { %v1874_v46 = vsel %vm882_vm2, %v1858_v43, %v1864_v44 }
 0x782   : > { %v1876_v48 = vsel %vm1875_vm11, %v1874_v46, %v1868_v45 }
 0x784   : > { %v1872_v47 = vpop.permute.xlu1 %1871 }
 0x785   : > { %v1878_v49 = vsel %vm1877_vm12, %v1876_v48, %v1872_v47 }
 0x786   : > { %2342 = vmatmul.mubr.msk.f32.vlgmr.msra.gmra.mxu0 %vm631_vm0, %v1878_v49 }
 0x846   : > { %v1959_v51 = vpop.f32.mrf.mxu0 }
 0x847   : > { %v1960_v52 = vadd.f32 %v2216_v50, %v1959_v51 }
 0x848   : > { %v2343_v53 = vpop.f32.mrf.mxu0 }
 0x849   : > { %v1963_v54 = vsel %vm631_vm0, %v1960_v52, 0.0 }
 0x84a   : > { %1964 = vadd.xlane.f32.xlu0 %v1963_v54 }
 0x8d3   : > { %v1965_v55 = vpop.xlane.xlu0 %1964 }
 0x8d4   : > { %v1967_v56 = vmul.f32 0.03125, %v1965_v55 }
 0x8d6   : > { %v1968_v57 = vsub.f32 %v1960_v52, %v1967_v56 }
 0x8d8   : > { %v1969_v58 = vmul.f32 %v1968_v57, %v1968_v57 }
 0x8da   : > { %v1970_v59 = vsel %vm631_vm0, %v1969_v58, 0.0 }
 0x8db   : > { %1971 = vadd.xlane.f32.xlu1 %v1970_v59 }
 0x964   : > { %v1972_v60 = vpop.xlane.xlu1 %1971 }
 0x965   : > { %v1973_v61 = vmul.f32 0.03125, %v1972_v60 }
 0x967   : > { %v1974_v62 = vadd.f32 1e-05, %v1973_v61 }
 0x969   : > { %2500 = vrsqrt.f32 %v1974_v62 }
 0x976   : > { %v2501_v1 = vpop.eup %2500 }
 0x977   : > { %v1976_v4 = vmul.f32 %v2501_v1, %v1968_v57 }
 0x979   : > { %v1984_v6 = vmul.f32 %v2218_v2, %v1976_v4 }
 0x97b   : > { %v1992_v7 = vadd.f32 %v2219_v5, %v1984_v6 }
 0x97d   : > { %1993 = vst.msk [vmem:[%s614_s16] sm:$0xff] %vm631_vm0, %v1992_v7 }
 0x97e   : > { %2703 = shalt.err (!%p2700_p4)
}
 0x97f   : > { %s2704_s20 = scalar_lea.hbm %s2007_s25, 128  ;;  %s2708_s5 = scalar_lea.hbm %s3400_s13, 256 }
 0x980   : > { %p2705_p8 = scmp.ne.s32.totalorder %s2007_s25, %s2704_s20  ;;  %p2709_p0 = scmp.lt.s32.totalorder %s2007_s25, %s3400_s13 }
 0x981   : > { %p2710_p13 = scmp.lt.s32.totalorder %s2708_s5, %s2704_s20 }
 0x982   : > { %p2706_p6 = pnand %p2705_p8, %p3401_p12 }
 0x983   : > { %p2711_p9 = por %p2710_p13, %p2709_p0 }
 0x984   : > { %p2707_p3 = pneg %p2706_p6 }
 0x986   : > { %p2712_p11 = pnand %p2711_p9, %p2707_p3 }
 0x988   : > { %2715 = shalt.err (!%p2712_p11)
}
 0x989   : > { %2366 = dma.vmem_to_hbm [thread:$0]  (%p3401_p12), %s2010_s3, 128, %s2007_s25, %s1995_s22  }
 0x98a PF: > { %s3402_s15 = sld [smem:[#allocation24_spill]] }
 0x98b   : > { %s3403_s14 = sld [smem:[#allocation31_spill]] }
 0x98c   : > { %s3404_s19 = sld [smem:[#allocation27_spill]] }
 0x990   : > { %s2021_s1 = sand.u32 1, %s3402_s15  }
 0x991   : > { %p3405_p2 = scmp.ne.s32.totalorder %s3403_s14, 0  ;;  %s2022_s16 = scalar_lea.sflag [#allocation8], %s2021_s1 }
 0x992   : > { %p3406_p5 = scmp.ge.s32.totalorder %s3404_s19, 2 }
 0x994   : > { %p2392_p10 = pnand %p3406_p5, %p3405_p2 }
 0x996   : > { %p2393_p1 = pneg %p2392_p10 }
 0x998   : > { %2757 = dma.done.wait (%p2393_p1), %s2022_s16, 128  }
 0x999   : > { %2759 = vsyncadd (%p2393_p1), %s2022_s16, 4294967168  ;;  %s34_s30 = sadd.s32 1, %s3404_s19   ;;  %s3407_s11 = sld [smem:[#allocation30_spill]] }
 0x99a   : > { %p31_p7 = scmp.ge.s32.totalorder %s34_s30, 4   ;;  %s3408_s28 = sld [smem:[#allocation26_spill]] }
 0x99b   : > { %s3409_s29 = sld [smem:[#allocation28_spill]]  ;;  %s3410_s25 = smov %s2766_s26 }
 0x99c   : > { %s3411_s26 = smov %s2770_s27  ;;  %33 = sbr.rel (!%p31_p7) target bundleno = 18 (0x12), region = 165 }
 0x99f   : > { %s3412_s27 = smov %s3407_s11 }
 0x9a1   :  { %2027 = vsyncpa [#allocation7], 1 }
 0x9a2   :  { %2029 = vsyncpa [#allocation7 + $0x1], 1 }
 0x9a3   :  { %2030 = vsyncpa [#allocation10], 1 }
 0x9a4   :  { %2032 = vsyncpa [#allocation10 + $0x1], 1 }
 0x9a5   :  { %2033 = vsyncpa [#allocation13], 1 }
 0x9a6   :  { %2034 = vsyncpa [#allocation16], 1 }
 0x9a7   :  { %2035 = vsyncpa [#allocation8], 1 }
 0x9a8   :  { %2037 = vsyncpa [#allocation8 + $0x1], 1 }

</bundles_post_ra>
